<compile_context>
chip_gen: v5e
topology: v5e:2x2
jax: 0.10.0
libtpu: 0.0.40
codegen_flags: <defaults>
</compile_context>

<pallas_src>
import functools

import jax
import jax.numpy as jnp
from jax.experimental import pallas as pl
from jax.experimental.pallas import tpu as pltpu


def _layernorm_rows(x_f32, g, b, eps=1e-5):
    # PyTorch nn.LayerNorm semantics (biased variance, eps inside sqrt); f32 math.
    mu = jnp.mean(x_f32, axis=-1, keepdims=True)
    xc = x_f32 - mu
    var = jnp.mean(xc * xc, axis=-1, keepdims=True)
    return xc * jax.lax.rsqrt(var + eps) * g.astype(jnp.float32) + b.astype(jnp.float32)


def _cross_attention_kernel(head_count, x1_ref, x2_ref, wrp_ref, brp_ref,
                            g_ref, b_ref, o_ref):
    x1 = x1_ref[...]                         # [Bt, N, D]  values    (input dtype)
    x2 = x2_ref[...]                         # [Bt, N, D]  keys / queries
    Bt, N, D = x1.shape
    dot_dtype = x1.dtype                     # keep matmul operands in input dtype
    x2f = x2.astype(jnp.float32)             # f32 only for exp / normalization math

    # ---- key softmax over tokens (torch: softmax(keys, dim=2) on [B, D, N]) --
    # Normalization folded into the context rows (smaller multiply, one fewer
    # full-size cast).
    km = jnp.max(x2f, axis=1, keepdims=True)                 # [Bt, 1, D]
    ke_f = jnp.exp(x2f - km)                                 # [Bt, N, D] f32
    ks = jnp.sum(ke_f, axis=1, keepdims=True)                # >= 1, safe for approx recip
    inv_ks = pl.reciprocal(ks, approx=True)                  # [Bt, 1, D]
    ke = ke_f.astype(dot_dtype)

    # ---- query softmax over channels within each head slice ------------------
    qm = jnp.max(x2f, axis=2, keepdims=True)                 # per-row max
    qe = jnp.exp(x2f - qm)
    if head_count == 1:
        qden = jnp.sum(qe, axis=2, keepdims=True)            # >= 1
        head_mask = None
    else:
        hk = D // head_count
        rid = jax.lax.broadcasted_iota(jnp.int32, (D, D), 0) // hk
        cid = jax.lax.broadcasted_iota(jnp.int32, (D, D), 1) // hk
        head_mask = (rid == cid).astype(jnp.float32)         # block-diagonal [D, D]
        # Per-head denominator via one small matmul (mask is symmetric); keeps
        # lanes dense, no head-axis relayout, no per-head Python loop.
        # TODO(synk): stabilization uses the row-global max; exact per-head max
        # would need a head-axis relayout.  Guard against a head whose exps all
        # underflow (only if inter-head dynamic range exceeds ~80 nats).
        qden = jnp.dot(qe.reshape(Bt * N, D), head_mask,
                       preferred_element_type=jnp.float32).reshape(Bt, N, D)
        qden = jnp.maximum(qden, jnp.float32(1e-30))
    query = (qe * pl.reciprocal(qden, approx=True)).astype(dot_dtype)    # [Bt, N, D]

    # ---- efficient attention ---------------------------------------------------
    # context[b, d, e] = (1/ks[b, d]) * sum_n ke[b, n, d] * value[b, n, e]
    context = jnp.einsum('bnd,bne->bde', ke, x1,
                         preferred_element_type=jnp.float32)             # [Bt, D, D]
    context = context * jnp.swapaxes(inv_ks, 1, 2)           # scale key-channel rows
    if head_mask is not None:
        context = context * head_mask[None]    # keep only same-head (d, e) blocks
    context = context.astype(dot_dtype)
    # agg[b, n, e] = sum_d query[b, n, d] * context[b, d, e]
    agg = jnp.einsum('bnd,bde->bne', query, context,
                     preferred_element_type=jnp.float32)                 # [Bt, N, D] f32

    # ---- 1x1-conv reprojection: per-token matmul on the flattened slab --------
    w = wrp_ref[...]                                                     # [D, 2D]
    rp = jnp.dot(agg.reshape(Bt * N, D).astype(w.dtype), w,
                 preferred_element_type=jnp.float32)
    rp = rp + brp_ref[...].astype(jnp.float32)                           # [Bt*N, 2D]

    # ---- LayerNorm(2 * value_channels) + store ---------------------------------
    y = _layernorm_rows(rp, g_ref[...], b_ref[...])
    o_ref[...] = y.reshape(Bt, N, 2 * D).astype(o_ref.dtype)


def _pick_block_b(B, N, D, act_itemsize, vmem_budget_bytes=8 << 20):
    # Rough per-batch-element VMEM estimate: double-buffered inputs/outputs plus
    # the f32 intermediates (exps, query, agg, reprojection) live in-kernel.
    io_bytes = 2 * (N * D * act_itemsize) * 2 + (N * 2 * D * act_itemsize) * 2
    work_bytes = N * D * 4 * 6 + N * 2 * D * 4 * 2
    per_b = max(io_bytes + work_bytes, 1)
    bb = max(1, min(B, vmem_budget_bytes // per_b))
    while B % bb:
        bb -= 1
    return bb


def cross_attention(x1, x2, params, height, width, head_count=1, block_b=None,
                    interpret=False):
    """Pallas implementation of DAEFormer Cross_Attention.forward.

    x1, x2: [B, N, D] token-major activations (N = height * width).
    params: (wrp [D, 2D], brp [1, 2D], ln_gamma [1, 2D], ln_beta [1, 2D]).
    Returns [B, N, 2D].
    """
    B, N, D = x1.shape
    assert x2.shape == (B, N, D)
    assert N == height * width
    assert D % head_count == 0, "head_count must divide the channel dim"
    wrp, brp, g, b = params
    assert wrp.shape == (D, 2 * D)

    if block_b is None:
        block_b = _pick_block_b(B, N, D, jnp.dtype(x1.dtype).itemsize)
    assert B % block_b == 0

    kernel = functools.partial(_cross_attention_kernel, head_count)

    def _param_spec(p):
        nd = p.ndim
        return pl.BlockSpec(p.shape, lambda i, _nd=nd: (0,) * _nd)

    return pl.pallas_call(
        kernel,
        out_shape=jax.ShapeDtypeStruct((B, N, 2 * D), x1.dtype),
        grid=(B // block_b,),
        in_specs=[
            pl.BlockSpec((block_b, N, D), lambda i: (i, 0, 0)),
            pl.BlockSpec((block_b, N, D), lambda i: (i, 0, 0)),
            _param_spec(wrp), _param_spec(brp), _param_spec(g), _param_spec(b),
        ],
        out_specs=pl.BlockSpec((block_b, N, 2 * D), lambda i: (i, 0, 0)),
        compiler_params=pltpu.CompilerParams(
            dimension_semantics=("parallel",),
            vmem_limit_bytes=32 * 1024 * 1024),
        interpret=interpret,
    )(x1, x2, wrp, brp, g, b)


def cross_attention_ref(x1, x2, params, height, width, head_count=1):
    """Pure-JAX mirror of the PyTorch forward (per-head loop), for validation."""
    B, N, D = x1.shape
    wrp, brp, g, b = params
    keys = jnp.swapaxes(x2, 1, 2)        # [B, D, N]
    queries = keys
    values = jnp.swapaxes(x1, 1, 2)      # [B, D, N]
    hk = D // head_count
    hv = D // head_count
    outs = []
    for i in range(head_count):
        key = jax.nn.softmax(keys[:, i * hk:(i + 1) * hk, :], axis=2)
        query = jax.nn.softmax(queries[:, i * hk:(i + 1) * hk, :], axis=1)
        value = values[:, i * hv:(i + 1) * hv, :]
        context = jnp.einsum('bkn,bvn->bkv', key, value)     # key @ value^T
        att = jnp.einsum('bkv,bkn->bvn', context, query)     # context^T @ query
        outs.append(att)
    agg = jnp.concatenate(outs, axis=1)                      # [B, D, N]
    rp = jnp.einsum('bdn,de->bne', agg, wrp) + brp.reshape(1, 1, 2 * D)
    mu = jnp.mean(rp, axis=-1, keepdims=True)
    var = jnp.mean((rp - mu) ** 2, axis=-1, keepdims=True)
    return (rp - mu) * jax.lax.rsqrt(var + 1e-5) * g.reshape(1, 1, -1) + b.reshape(1, 1, -1)


def make_params(key, value_channels, dtype=jnp.float32):
    D, D2 = value_channels, 2 * value_channels
    ks = jax.random.split(key, 4)
    wrp = (0.2 * jax.random.normal(ks[0], (D, D2), jnp.float32)).astype(dtype)  # 1x1 conv W^T
    brp = (0.05 * jax.random.normal(ks[1], (1, D2), jnp.float32)).astype(dtype)
    g = (1.0 + 0.02 * jax.random.normal(ks[2], (1, D2), jnp.float32)).astype(dtype)
    b = (0.02 * jax.random.normal(ks[3], (1, D2), jnp.float32)).astype(dtype)
    return (wrp, brp, g, b)


if __name__ == "__main__":
    B, H, W, D = 2, 8, 8, 16          # key_channels = value_channels = 16, N = 64
    N = H * W
    root = jax.random.PRNGKey(0)
    k1, k2, kp = jax.random.split(root, 3)
    x1 = jax.random.normal(k1, (B, N, D), jnp.float32)
    x2 = jax.random.normal(k2, (B, N, D), jnp.float32)
    params = make_params(kp, D)

    # Exercise both the single-head and the multi-head (block-diagonal mask) paths
    # and validate against the pure-JAX per-head reference.
    for hc in (1, 2):
        out = jax.block_until_ready(cross_attention(x1, x2, params, H, W, head_count=hc))
        assert out.shape == (B, N, 2 * D)
        assert bool(jnp.all(jnp.isfinite(out)))
        ref = jax.block_until_ready(cross_attention_ref(x1, x2, params, H, W, head_count=hc))
        max_abs = float(jnp.max(jnp.abs(out - ref)))
        # Tolerance absorbs MXU default-precision matmuls + approx reciprocals.
        assert max_abs < 5e-2, f"head_count={hc} max_abs_diff={max_abs}"

    print("KERNEL_OK")
</pallas_src>

<mosaic_0001>
module attributes {stable_mosaic.version = 11 : i64} {
  func.func @_cross_attention_kernel(%arg0: i32, %arg1: memref<2x64x16xf32, #tpu.memory_space<vmem>>, %arg2: memref<2x64x16xf32, #tpu.memory_space<vmem>>, %arg3: memref<16x32xf32, #tpu.memory_space<vmem>>, %arg4: memref<1x32xf32, #tpu.memory_space<vmem>>, %arg5: memref<1x32xf32, #tpu.memory_space<vmem>>, %arg6: memref<1x32xf32, #tpu.memory_space<vmem>>, %arg7: memref<2x64x32xf32, #tpu.memory_space<vmem>>) attributes {dimension_semantics = [#tpu.dimension_semantics<parallel>], iteration_bounds = array<i64: 1>, scalar_prefetch = 0 : i64, scratch_operands = 0 : i64, tpu.core_type = #tpu.core_type<tc>, window_params = [{transform_indices = @transform_0, window_bounds = array<i64: 2, 64, 16>}, {transform_indices = @transform_1, window_bounds = array<i64: 2, 64, 16>}, {pipeline_mode = #tpu.pipeline_mode<synchronous>, transform_indices = @transform_2, window_bounds = array<i64: 16, 32>}, {pipeline_mode = #tpu.pipeline_mode<synchronous>, transform_indices = @transform_3, window_bounds = array<i64: 1, 32>}, {pipeline_mode = #tpu.pipeline_mode<synchronous>, transform_indices = @transform_4, window_bounds = array<i64: 1, 32>}, {pipeline_mode = #tpu.pipeline_mode<synchronous>, transform_indices = @transform_5, window_bounds = array<i64: 1, 32>}, {transform_indices = @transform_6, window_bounds = array<i64: 2, 64, 32>}]} {
    %c0 = arith.constant 0 : index
    %c0_0 = arith.constant 0 : index
    %c0_1 = arith.constant 0 : index
    %0 = vector.load %arg1[%c0, %c0_0, %c0_1] : memref<2x64x16xf32, #tpu.memory_space<vmem>>, vector<2x64x16xf32>
    %c0_2 = arith.constant 0 : index
    %c0_3 = arith.constant 0 : index
    %c0_4 = arith.constant 0 : index
    %1 = vector.load %arg2[%c0_2, %c0_3, %c0_4] : memref<2x64x16xf32, #tpu.memory_space<vmem>>, vector<2x64x16xf32>
    %cst = arith.constant dense<0xFF800000> : vector<2x16xf32>
    %2 = vector.multi_reduction <maximumf>, %1, %cst [1] : vector<2x64x16xf32> to vector<2x16xf32>
    %3 = vector.shape_cast %2 : vector<2x16xf32> to vector<2x1x16xf32>
    %4 = vector.broadcast %3 : vector<2x1x16xf32> to vector<2x64x16xf32>
    %5 = arith.subf %1, %4 : vector<2x64x16xf32>
    %6 = math.exp %5 : vector<2x64x16xf32>
    %cst_5 = arith.constant dense<0.000000e+00> : vector<2x16xf32>
    %7 = vector.multi_reduction <add>, %6, %cst_5 [1] : vector<2x64x16xf32> to vector<2x16xf32>
    %8 = vector.shape_cast %7 : vector<2x16xf32> to vector<2x1x16xf32>
    %9 = tpu.reciprocal %8 {approx = true} : vector<2x1x16xf32> -> vector<2x1x16xf32>
    %cst_6 = arith.constant dense<0xFF800000> : vector<2x64xf32>
    %10 = vector.multi_reduction <maximumf>, %1, %cst_6 [2] : vector<2x64x16xf32> to vector<2x64xf32>
    %11 = vector.shape_cast %10 : vector<2x64xf32> to vector<2x64x1xf32>
    %12 = vector.broadcast %11 : vector<2x64x1xf32> to vector<2x64x16xf32>
    %13 = arith.subf %1, %12 : vector<2x64x16xf32>
    %14 = math.exp %13 : vector<2x64x16xf32>
    %cst_7 = arith.constant dense<0.000000e+00> : vector<2x64xf32>
    %15 = vector.multi_reduction <add>, %14, %cst_7 [2] : vector<2x64x16xf32> to vector<2x64xf32>
    %16 = vector.shape_cast %15 : vector<2x64xf32> to vector<2x64x1xf32>
    %17 = tpu.reciprocal %16 {approx = true} : vector<2x64x1xf32> -> vector<2x64x1xf32>
    %18 = vector.broadcast %17 : vector<2x64x1xf32> to vector<2x64x16xf32>
    %19 = arith.mulf %14, %18 : vector<2x64x16xf32>
    "tpu.trace_start"() <{level = 10 : i32, message = "bnd,bne->bde"}> : () -> ()
    %cst_8 = arith.constant dense<0.000000e+00> : vector<2x16x16xf32>
    %20 = tpu.matmul %6, %0, %cst_8 {dimension_numbers = #tpu.dot_dimension_numbers<[1], [1], [2], [2], [0, 0, 0, 2, 1, 2], [0], [0]>} : vector<2x64x16xf32>, vector<2x64x16xf32>, vector<2x16x16xf32> -> vector<2x16x16xf32>
    "tpu.trace_stop"() : () -> ()
    %21 = tpu.transpose %9, [0, 2, 1] : vector<2x1x16xf32> -> vector<2x16x1xf32>
    %22 = vector.broadcast %21 : vector<2x16x1xf32> to vector<2x16x16xf32>
    %23 = arith.mulf %20, %22 : vector<2x16x16xf32>
    "tpu.trace_start"() <{level = 10 : i32, message = "bnd,bde->bne"}> : () -> ()
    %cst_9 = arith.constant dense<0.000000e+00> : vector<2x64x16xf32>
    %24 = tpu.matmul %19, %23, %cst_9 {dimension_numbers = #tpu.dot_dimension_numbers<[2], [1], [1], [2], [0, 0, 0, 1, 1, 2], [0], [0]>} : vector<2x64x16xf32>, vector<2x16x16xf32>, vector<2x64x16xf32> -> vector<2x64x16xf32>
    "tpu.trace_stop"() : () -> ()
    %c0_10 = arith.constant 0 : index
    %c0_11 = arith.constant 0 : index
    %25 = vector.load %arg3[%c0_10, %c0_11] : memref<16x32xf32, #tpu.memory_space<vmem>>, vector<16x32xf32>
    %26 = vector.shape_cast %24 : vector<2x64x16xf32> to vector<128x16xf32>
    %cst_12 = arith.constant dense<0.000000e+00> : vector<128x32xf32>
    %27 = tpu.matmul %26, %25, %cst_12 {dimension_numbers = #tpu.dot_dimension_numbers<[1], [0], [0], [1], [0, 0, 1, 1], [], []>} : vector<128x16xf32>, vector<16x32xf32>, vector<128x32xf32> -> vector<128x32xf32>
    %c0_13 = arith.constant 0 : index
    %c0_14 = arith.constant 0 : index
    %28 = vector.load %arg4[%c0_13, %c0_14] : memref<1x32xf32, #tpu.memory_space<vmem>>, vector<1x32xf32>
    %29 = vector.broadcast %28 : vector<1x32xf32> to vector<128x32xf32>
    %30 = arith.addf %27, %29 : vector<128x32xf32>
    %c0_15 = arith.constant 0 : index
    %c0_16 = arith.constant 0 : index
    %31 = vector.load %arg5[%c0_15, %c0_16] : memref<1x32xf32, #tpu.memory_space<vmem>>, vector<1x32xf32>
    %c0_17 = arith.constant 0 : index
    %c0_18 = arith.constant 0 : index
    %32 = vector.load %arg6[%c0_17, %c0_18] : memref<1x32xf32, #tpu.memory_space<vmem>>, vector<1x32xf32>
    %cst_19 = arith.constant dense<0.000000e+00> : vector<128xf32>
    %33 = vector.multi_reduction <add>, %30, %cst_19 [1] : vector<128x32xf32> to vector<128xf32>
    %34 = vector.shape_cast %33 : vector<128xf32> to vector<128x1xf32>
    %cst_20 = arith.constant 3.200000e+01 : f32
    %35 = vector.broadcast %cst_20 : f32 to vector<128x1xf32>
    %36 = arith.divf %34, %35 : vector<128x1xf32>
    %37 = vector.broadcast %36 : vector<128x1xf32> to vector<128x32xf32>
    %38 = arith.subf %30, %37 : vector<128x32xf32>
    %39 = arith.mulf %38, %38 : vector<128x32xf32>
    %cst_21 = arith.constant dense<0.000000e+00> : vector<128xf32>
    %40 = vector.multi_reduction <add>, %39, %cst_21 [1] : vector<128x32xf32> to vector<128xf32>
    %41 = vector.shape_cast %40 : vector<128xf32> to vector<128x1xf32>
    %cst_22 = arith.constant 3.200000e+01 : f32
    %42 = vector.broadcast %cst_22 : f32 to vector<128x1xf32>
    %43 = arith.divf %41, %42 : vector<128x1xf32>
    %cst_23 = arith.constant 9.99999974E-6 : f32
    %44 = vector.broadcast %cst_23 : f32 to vector<128x1xf32>
    %45 = arith.addf %43, %44 : vector<128x1xf32>
    %46 = math.rsqrt %45 : vector<128x1xf32>
    %47 = vector.broadcast %46 : vector<128x1xf32> to vector<128x32xf32>
    %48 = arith.mulf %38, %47 : vector<128x32xf32>
    %49 = vector.broadcast %31 : vector<1x32xf32> to vector<128x32xf32>
    %50 = arith.mulf %48, %49 : vector<128x32xf32>
    %51 = vector.broadcast %32 : vector<1x32xf32> to vector<128x32xf32>
    %52 = arith.addf %50, %51 : vector<128x32xf32>
    %53 = vector.shape_cast %52 : vector<128x32xf32> to vector<2x64x32xf32>
    %c0_24 = arith.constant 0 : index
    %c0_25 = arith.constant 0 : index
    %c0_26 = arith.constant 0 : index
    %54 = vector.load %arg7[%c0_24, %c0_25, %c0_26] : memref<2x64x32xf32, #tpu.memory_space<vmem>>, vector<2x64x32xf32>
    tpu.vector_store %arg7[%c0_24, %c0_25, %c0_26], %53 {strides = array<i32>} : memref<2x64x32xf32, #tpu.memory_space<vmem>>, vector<2x64x32xf32>,
    return
  }
  func.func @transform_0(%arg0: i32) -> (i32, i32, i32) {
    %c0_i32 = arith.constant 0 : i32
    %c0_i32_0 = arith.constant 0 : i32
    %c0_i32_1 = arith.constant 0 : i32
    return %arg0, %c0_i32, %c0_i32_0 : i32, i32, i32
  }
  func.func @transform_1(%arg0: i32) -> (i32, i32, i32) {
    %c0_i32 = arith.constant 0 : i32
    %c0_i32_0 = arith.constant 0 : i32
    %c0_i32_1 = arith.constant 0 : i32
    return %arg0, %c0_i32, %c0_i32_0 : i32, i32, i32
  }
  func.func @transform_2(%arg0: i32) -> (i32, i32) {
    %c0_i32 = arith.constant 0 : i32
    %c0_i32_0 = arith.constant 0 : i32
    %c0_i32_1 = arith.constant 0 : i32
    return %c0_i32, %c0_i32_0 : i32, i32
  }
  func.func @transform_3(%arg0: i32) -> (i32, i32) {
    %c0_i32 = arith.constant 0 : i32
    %c0_i32_0 = arith.constant 0 : i32
    %c0_i32_1 = arith.constant 0 : i32
    return %c0_i32, %c0_i32_0 : i32, i32
  }
  func.func @transform_4(%arg0: i32) -> (i32, i32) {
    %c0_i32 = arith.constant 0 : i32
    %c0_i32_0 = arith.constant 0 : i32
    %c0_i32_1 = arith.constant 0 : i32
    return %c0_i32, %c0_i32_0 : i32, i32
  }
  func.func @transform_5(%arg0: i32) -> (i32, i32) {
    %c0_i32 = arith.constant 0 : i32
    %c0_i32_0 = arith.constant 0 : i32
    %c0_i32_1 = arith.constant 0 : i32
    return %c0_i32, %c0_i32_0 : i32, i32
  }
  func.func @transform_6(%arg0: i32) -> (i32, i32, i32) {
    %c0_i32 = arith.constant 0 : i32
    %c0_i32_0 = arith.constant 0 : i32
    %c0_i32_1 = arith.constant 0 : i32
    return %arg0, %c0_i32, %c0_i32_0 : i32, i32, i32
  }
}

</mosaic_0001>

<bundles_post_ra>
// kernel: tpu_custom_call.1
= control target key start
LH: loop header
LB: loop body
LE: loop exit
PB: predicated region body
PF: predicated region fallthrough
CT: control target
= control target key end

     0   :  { %vm55_vm0 = vcmask 130048   ;;  %vm382_vm1 = vcmask 523264   ;;  %vm812_vm2 = vcmask 261120   ;;  %s2224_s1 = inlined_call_operand.vmem [shape: f32[2,64,16], index: 1, kind: input, shape index: {}]   ;;  %s2225_s0 = inlined_call_operand.vmem [shape: f32[2,64,16], index: 0, kind: input, shape index: {}]   ;;  %s2226_s2 = inlined_call_operand.vmem [shape: f32[16,32], index: 2, kind: input, shape index: {}]   ;;  %s2227_s3 = inlined_call_operand.vmem [shape: f32[1,32], index: 3, kind: input, shape index: {}]   ;;  %s2228_s4 = inlined_call_operand.vmem [shape: f32[1,32], index: 4, kind: input, shape index: {}]   ;;  %s2229_s5 = inlined_call_operand.vmem [shape: f32[1,32], index: 5, kind: input, shape index: {}]   ;;  %s2230_s6 = inlined_call_operand.vmem [shape: f32[2,64,32], index: 6, kind: output, shape index: {}]  }
   0x1   :  { %v1452_v0 = vld [vmem:[%s2224_s1] sm:$0xff]  ;;  %v1457_v1 = vld [vmem:[%s2224_s1 + $0x8] sm:$0xff]  ;;  %v1462_v2 = vld [vmem:[%s2224_s1 + $0x10] sm:$0xff] }
   0x2   :  { %v56_v3 = vsel %vm55_vm0, %v1452_v0, -inf  ;;  %v57_v4 = vsel %vm55_vm0, %v1457_v1, -inf  ;;  %v1471_v5 = vld [vmem:[%s2224_s1 + $0x20] sm:$0xff]  ;;  %v1476_v6 = vld [vmem:[%s2224_s1 + $0x30] sm:$0xff]  ;;  %v58_v7 = vsel %vm55_vm0, %v1462_v2, -inf  ;;  %v1483_v8 = vld [vmem:[%s2224_s1 + $0x18] sm:$0xff] }
   0x3   :  { %190 = vmax.xlane.f32.xlu2 %v56_v3  ;;  %v1487_v9 = vsel %vm55_vm0, %v1471_v5, -inf  ;;  %v1491_v10 = vsel %vm55_vm0, %v1476_v6, -inf  ;;  %v59_v11 = vmax.f32 %v56_v3, %v58_v7  ;;  %v1496_v12 = vld [vmem:[%s2224_s1 + $0x28] sm:$0xff]  ;;  %v1501_v13 = vld [vmem:[%s2224_s1 + $0x38] sm:$0xff]  ;;  %v60_v14 = vsel %vm55_vm0, %v1483_v8, -inf  ;;  %v1508_v15 = vld [vmem:[%s2224_s1 + $0x40] sm:$0xff] }
   0x4   :  { %v61_v16 = vmax.f32 %v57_v4, %v60_v14  ;;  %v1512_v17 = vsel %vm55_vm0, %v1496_v12, -inf  ;;  %v1516_v18 = vsel %vm55_vm0, %v1501_v13, -inf  ;;  %v1521_v19 = vld [vmem:[%s2224_s1 + $0x48] sm:$0xff]  ;;  %v1526_v20 = vld [vmem:[%s2224_s1 + $0x50] sm:$0xff]  ;;  %v1531_v21 = vld [vmem:[%s2224_s1 + $0x58] sm:$0xff]  ;;  %v1535_v22 = vsel %vm55_vm0, %v1508_v15, -inf }
   0x5   :  { %v63_v23 = vmax.f32 %v59_v11, %v1487_v9  ;;  %v1541_v24 = vld [vmem:[%s2224_s1 + $0x60] sm:$0xff]  ;;  %v1546_v25 = vld [vmem:[%s2224_s1 + $0x68] sm:$0xff]  ;;  %v1551_v26 = vld [vmem:[%s2224_s1 + $0x70] sm:$0xff]  ;;  %v1555_v27 = vsel %vm55_vm0, %v1521_v19, -inf  ;;  %v1559_v28 = vsel %vm55_vm0, %v1526_v20, -inf  ;;  %v1563_v29 = vsel %vm55_vm0, %v1531_v21, -inf }
   0x6   :  { %v65_v30 = vmax.f32 %v61_v16, %v1512_v17  ;;  %v1569_v31 = vld [vmem:[%s2224_s1 + $0x78] sm:$0xff]  ;;  %v80_v32 = vmax.f32 %v1535_v22, %v1559_v28  ;;  %v82_v33 = vmax.f32 %v1555_v27, %v1563_v29  ;;  %v1577_v34 = vsel %vm55_vm0, %v1541_v24, -inf }
   0x7   :  { %v67_v35 = vmax.f32 %v63_v23, %v1491_v10  ;;  %v1582_v36 = vsel %vm55_vm0, %v1546_v25, -inf  ;;  %v1586_v37 = vsel %vm55_vm0, %v1551_v26, -inf  ;;  %v1590_v38 = vsel %vm55_vm0, %v1569_v31, -inf }
   0x8   :  { %v69_v39 = vmax.f32 %v65_v30, %v1516_v18  ;;  %v84_v40 = vmax.f32 %v80_v32, %v1577_v34  ;;  %v86_v41 = vmax.f32 %v82_v33, %v1582_v36 }
   0xa   :  { %v70_v42 = vmax.f32 %v67_v35, %v69_v39  ;;  %v88_v43 = vmax.f32 %v84_v40, %v1586_v37  ;;  %v90_v44 = vmax.f32 %v86_v41, %v1590_v38 }
   0xb   :  { %192 = vmax.xlane.f32.xlu2 %v57_v4 }
   0xc   :  { %v71_v45 = vrot.slane %v70_v42, 4  ;;  %v91_v46 = vmax.f32 %v88_v43, %v90_v44 }
   0xe   :  { %v72_v47 = vmax.f32 %v70_v42, %v71_v45  ;;  %v92_v48 = vrot.slane %v91_v46, 4 }
  0x10   :  { %v73_v49 = vrot.slane %v72_v47, 2  ;;  %v93_v50 = vmax.f32 %v91_v46, %v92_v48 }
  0x12   :  { %v74_v51 = vmax.f32 %v72_v47, %v73_v49  ;;  %v94_v52 = vrot.slane %v93_v50, 2 }
  0x13   :  { %194 = vmax.xlane.f32.xlu2 %v58_v7 }
  0x14   :  { %v75_v53 = vrot.slane %v74_v51, 1  ;;  %v95_v54 = vmax.f32 %v93_v50, %v94_v52 }
  0x16   :  { %v76_v55 = vmax.f32 %v74_v51, %v75_v53  ;;  %v96_v56 = vrot.slane %v95_v54, 1 }
  0x18   :  { %v101_v57 = vsub.f32 %v1483_v8, %v76_v55  ;;  %v103_v58 = vsub.f32 %v1496_v12, %v76_v55  ;;  %v1599_v59 = vmax.f32 %v95_v54, %v96_v56  ;;  %v98_v60 = vsub.f32 %v1452_v0, %v76_v55 }
  0x19   :  { %v99_v3 = vsub.f32 %v1457_v1, %v76_v55  ;;  %v100_v23 = vsub.f32 %v1462_v2, %v76_v55  ;;  %v102_v39 = vsub.f32 %v1471_v5, %v76_v55  ;;  %v104_v41 = vsub.f32 %v1476_v6, %v76_v55 }
  0x1a   :  { %v120_v61 = vmul.f32 1.442695, %v101_v57  ;;  %v124_v62 = vmul.f32 1.442695, %v103_v58  ;;  %v106_v63 = vsub.f32 %v1508_v15, %v1599_v59  ;;  %v107_v4 = vsub.f32 %v1521_v19, %v1599_v59 }
  0x1b   :  { %196 = vmax.xlane.f32.xlu2 %v60_v14  ;;  %v108_v7 = vsub.f32 %v1526_v20, %v1599_v59  ;;  %v114_v16 = vmul.f32 1.442695, %v98_v60  ;;  %v109_v32 = vsub.f32 %v1531_v21, %v1599_v59  ;;  %v116_v33 = vmul.f32 1.442695, %v99_v3 }
  0x1c   :  { %v130_v11 = vmul.f32 1.442695, %v106_v63  ;;  %1278 = vpow2.f32 %v120_v61  ;;  %v132_v30 = vmul.f32 1.442695, %v107_v4  ;;  %v110_v14 = vsub.f32 %v1541_v24, %v1599_v59 }
  0x1d   :  { %1280 = vpow2.f32 %v124_v62  ;;  %v134_v35 = vmul.f32 1.442695, %v108_v7  ;;  %v118_v40 = vmul.f32 1.442695, %v100_v23  ;;  %v105_v42 = vsub.f32 %v1501_v13, %v76_v55 }
  0x1e   :  { %1282 = vpow2.f32 %v130_v11  ;;  %v136_v43 = vmul.f32 1.442695, %v109_v32  ;;  %v138_v44 = vmul.f32 1.442695, %v110_v14  ;;  %v122_v46 = vmul.f32 1.442695, %v102_v39 }
  0x1f   :  { %1284 = vpow2.f32 %v114_v16  ;;  %v126_v48 = vmul.f32 1.442695, %v104_v41  ;;  %v128_v50 = vmul.f32 1.442695, %v105_v42  ;;  %v111_v53 = vsub.f32 %v1546_v25, %v1599_v59 }
  0x20   :  { %1286 = vpow2.f32 %v132_v30 }
  0x21   :  { %1288 = vpow2.f32 %v116_v33  ;;  %v140_v58 = vmul.f32 1.442695, %v111_v53 }
  0x22   :  { %v1617_v45 = vpop.eup %1278  ;;  %1290 = vpow2.f32 %v134_v35 }
  0x23   :  { %v1619_v47 = vpop.eup %1280  ;;  %1292 = vpow2.f32 %v118_v40  ;;  %v151_v11 = vsel %vm55_vm0, %v1617_v45, 0.0 }
  0x24   :  { %v1283_v49 = vpop.eup %1282  ;;  %1294 = vpow2.f32 %v136_v43  ;;  %v112_v43 = vsub.f32 %v1551_v26, %v1599_v59 }
  0x25   :  { %v1285_v51 = vpop.eup %1284  ;;  %412 = vxpose.xlu1.b32.start [1/8] (short) (narrow) %v1283_v49, 16  ;;  %v167_v52 = vsel %vm55_vm0, %v1283_v49, 0.0  ;;  %1296 = vpow2.f32 %v138_v44 }
  0x26   :  { %v1287_v54 = vpop.eup %1286  ;;  %350 = vxpose.xlu0.b32.start [1/8] (short) (narrow) %v1285_v51, 16  ;;  %v146_v55 = vsel %vm55_vm0, %v1285_v51, 0.0  ;;  %1298 = vpow2.f32 %v122_v46  ;;  %v155_v46 = vsel %vm55_vm0, %v1619_v47, 0.0  ;;  %v142_v51 = vmul.f32 1.442695, %v112_v43  ;;  %v26_v43 = vld [vmem:[%s2225_s0 + $0x18] sm:$0xff] }
  0x27   :  { %v1289_v56 = vpop.eup %1288  ;;  %v168_v57 = vsel %vm55_vm0, %v1287_v54, 0.0  ;;  %1300 = vpow2.f32 %v126_v48 }
  0x28   :  { %v1291_v60 = vpop.eup %1290  ;;  %1302 = vpow2.f32 %v128_v50  ;;  %v169_v61 = vadd.f32 %v168_v57, %v167_v52  ;;  %v147_v62 = vsel %vm55_vm0, %v1289_v56, 0.0 }
  0x29   :  { %v1293_v63 = vpop.eup %1292  ;;  %v148_v3 = vadd.f32 %v147_v62, %v146_v55  ;;  %v170_v4 = vsel %vm55_vm0, %v1291_v60, 0.0  ;;  %1304 = vpow2.f32 %v140_v58  ;;  %v113_v62 = vsub.f32 %v1569_v31, %v1599_v59 }
  0x2a   :  { %v1295_v7 = vpop.eup %1294  ;;  %v171_v16 = vadd.f32 %v170_v4, %v169_v61  ;;  %v149_v23 = vsel %vm55_vm0, %v1293_v63, 0.0  ;;  %1306 = vpow2.f32 %v142_v51 }
  0x2b   :  { %v1297_v30 = vpop.eup %1296  ;;  %v150_v32 = vadd.f32 %v149_v23, %v148_v3  ;;  %v172_v33 = vsel %vm55_vm0, %v1295_v7, 0.0  ;;  %v144_v4 = vmul.f32 1.442695, %v113_v62 }
  0x2c   :  { %v1299_v14 = vpop.eup %1298  ;;  %v173_v35 = vadd.f32 %v172_v33, %v171_v16  ;;  %v174_v39 = vsel %vm55_vm0, %v1297_v30, 0.0 }
  0x2d   :  { %v1301_v40 = vpop.eup %1300  ;;  %413 = vxpose.xlu1.b32.cont [2/8] (short) (narrow) %v1287_v54, 16  ;;  %v152_v41 = vadd.f32 %v151_v11, %v150_v32  ;;  %v153_v42 = vsel %vm55_vm0, %v1299_v14, 0.0  ;;  %1308 = vpow2.f32 %v144_v4 }
  0x2e   :  { %v1303_v44 = vpop.eup %1302  ;;  %351 = vxpose.xlu0.b32.cont [2/8] (short) (narrow) %v1289_v56, 16  ;;  %v175_v48 = vadd.f32 %v174_v39, %v173_v35  ;;  %v157_v52 = vsel %vm55_vm0, %v1301_v40, 0.0 }
  0x2f   :  { %v1305_v49 = vpop.eup %1304  ;;  %v154_v50 = vadd.f32 %v153_v42, %v152_v41  ;;  %v159_v57 = vsel %vm55_vm0, %v1303_v44, 0.0  ;;  %v29_v42 = vld [vmem:[%s2225_s0 + $0x30] sm:$0xff] }
  0x30   :  { %v176_v53 = vsel %vm55_vm0, %v1305_v49, 0.0  ;;  %v1307_v56 = vpop.eup %1306 }
  0x31   :  { %v156_v54 = vadd.f32 %v155_v46, %v154_v50  ;;  %v177_v55 = vadd.f32 %v176_v53, %v175_v48  ;;  %v178_v11 = vsel %vm55_vm0, %v1307_v56, 0.0  ;;  %v24_v46 = vld [vmem:[%s2225_s0 + $0x8] sm:$0xff] }
  0x33   :  { %v158_v58 = vadd.f32 %v157_v52, %v156_v54  ;;  %v179_v23 = vadd.f32 %v178_v11, %v177_v55  ;;  %v1309_v35 = vpop.eup %1308 }
  0x34   :  { %v180_v39 = vsel %vm55_vm0, %v1309_v35, 0.0 }
  0x35   :  { %414 = vxpose.xlu1.b32.cont [3/8] (short) (narrow) %v1291_v60, 16  ;;  %v160_v61 = vadd.f32 %v159_v57, %v158_v58  ;;  %v1646_v59 = vadd.f32 %v180_v39, %v179_v23 }
  0x36   :  { %352 = vxpose.xlu0.b32.cont [3/8] (short) (narrow) %v1293_v63, 16 }
  0x37   :  { %v161_v3 = vrot.slane %v160_v61, 4 }
  0x39   :  { %v162_v16 = vadd.f32 %v161_v3, %v160_v61  ;;  %v182_v61 = vrot.slane %v1646_v59, 4 }
  0x3b   :  { %v163_v32 = vrot.slane %v162_v16, 2 }
  0x3d   :  { %415 = vxpose.xlu1.b32.cont [4/8] (short) (narrow) %v1295_v7, 16  ;;  %v164_v33 = vadd.f32 %v163_v32, %v162_v16  ;;  %v30_v7 = vld [vmem:[%s2225_s0 + $0x38] sm:$0xff] }
  0x3e   :  { %353 = vxpose.xlu0.b32.cont [4/8] (short) (narrow) %v1617_v45, 16  ;;  %397 = vmatpush.msra.mxu0 %v30_v7 }
  0x3f   :  { %v165_v60 = vrot.slane %v164_v33, 1 }
  0x40   :  { %398 = vmatpush.msra.mxu0 %v29_v42 }
  0x41   :  { %v166_v41 = vadd.f32 %v165_v60, %v164_v33 }
  0x43   :  { %1310 = vrcp.f32 %v166_v41 }
  0x45   :  { %416 = vxpose.xlu1.b32.cont [5/8] (short) (narrow) %v1297_v30, 16  ;;  %v28_v30 = vld [vmem:[%s2225_s0 + $0x28] sm:$0xff] }
  0x46   :  { %354 = vxpose.xlu0.b32.cont [5/8] (short) (narrow) %v1299_v14, 16  ;;  %399 = vmatpush.msra.mxu0 %v28_v30  ;;  %v27_v14 = vld [vmem:[%s2225_s0 + $0x20] sm:$0xff] }
  0x48   :  { %400 = vmatpush.msra.mxu0 %v27_v14 }
  0x49   :  { %v1311_v63 = vpop.eup %1310 }
  0x4a   :  { %473 = vxpose.xlu2.b32.start.end [1/1] (short) (narrow) %v1311_v63, 16  ;;  %401 = vmatpush.msra.mxu0 %v26_v43 }
  0x4d   :  { %417 = vxpose.xlu1.b32.cont [6/8] (short) (narrow) %v1305_v49, 16  ;;  %v23_v49 = vld [vmem:[%s2225_s0] sm:$0xff] }
  0x4e   :  { %355 = vxpose.xlu0.b32.cont [6/8] (short) (narrow) %v1619_v47, 16 }
  0x55   :  { %418 = vxpose.xlu1.b32.cont [7/8] (short) (narrow) %v1307_v56, 16  ;;  %v183_v56 = vadd.f32 %v182_v61, %v1646_v59  ;;  %v32_v61 = vld [vmem:[%s2225_s0 + $0x48] sm:$0xff] }
  0x56   :  { %356 = vxpose.xlu0.b32.cont [7/8] (short) (narrow) %v1301_v40, 16 }
  0x57   :  { %v184_v3 = vrot.slane %v183_v56, 2 }
  0x5d   :  { %419 = vxpose.xlu1.b32.end [8/8] (short) (narrow) %v1309_v35, 16 }
  0x5e   :  { %357 = vxpose.xlu0.b32.end [8/8] (short) (narrow) %v1303_v44, 16  ;;  %v25_v44 = vld [vmem:[%s2225_s0 + $0x10] sm:$0xff] }
  0x5f   :  { %402 = vmatpush.msra.mxu0 %v25_v44 }
  0x61   :  { %403 = vmatpush.msra.mxu0 %v24_v46 }
  0x63   :  { %404 = vmatpush.msra.mxu0 %v23_v49 }
  0x76   :  { %v191_v45 = vpop.xlane.xlu2 %190 }
  0x77   :  { %v222_v40 = vsub.f32 %v1452_v0, %v191_v45 }
  0x79   :  { %v238_v48 = vmul.f32 1.442695, %v222_v40 }
  0x7b   :  { %1312 = vpow2.f32 %v238_v48 }
  0x7e   :  { %v193_v47 = vpop.xlane.xlu2 %192 }
  0x7f   :  { %v223_v0 = vsub.f32 %v1457_v1, %v193_v47 }
  0x81   :  { %v240_v51 = vmul.f32 1.442695, %v223_v0  ;;  %v1678_v52 = vpop.eup %1312 }
  0x83   :  { %1314 = vpow2.f32 %v240_v51 }
  0x86   :  { %v195_v50 = vpop.xlane.xlu2 %194 }
  0x89   :  { %v1684_v54 = vpop.eup %1314 }
  0x8a   :  { %v273_v55 = vsel %vm55_vm0, %v1684_v54, 0.0 }
  0x8e   :  { %v197_v53 = vpop.xlane.xlu2 %196 }
  0xbd   :  { %206 = vmax.xlane.f32.xlu1 %v1535_v22  ;;  %v1412_v22 = vmov 0  }
  0xbe   :  { %1274 = vset.pattern.permute.xlu1 %v1412_v22 }
  0xc3   :  { %198 = vmax.xlane.f32.xlu2 %v1487_v9  ;;  %v270_v9 = vsel %vm55_vm0, %v1678_v52, 0.0 }
  0xc5   :  { %208 = vmax.xlane.f32.xlu1 %v1555_v27  ;;  %1273 = vset.pattern.permute.xlu0 %v1412_v22  ;;  %v225_v27 = vsub.f32 %v1483_v8, %v197_v53  ;;  %v36_v53 = vld [vmem:[%s2225_s0 + $0x68] sm:$0xff] }
  0xc9   :  { %v1707_v33 = vpop.trf.xlu1 }
  0xca   :  { %v366_v1 = vpop.trf.xlu0 }
  0xcb   :  { %202 = vmax.xlane.f32.xlu2 %v1491_v10  ;;  %1230 = vmatmul.msk.f32.vlgmr.msra.gmra.mxu0 %vm382_vm1, %v366_v1  ;;  %v244_v10 = vmul.f32 1.442695, %v225_v27  ;;  %v38_v1 = vld [vmem:[%s2225_s0 + $0x78] sm:$0xff] }
  0xcc   :  { %458 = vmatpush.msra.mxu1 %v38_v1 }
  0xcd   :  { %271 = vadd.xlane.f32.xlu1 %v270_v9  ;;  %1316 = vpow2.f32 %v244_v10  ;;  %v37_v9 = vld [vmem:[%s2225_s0 + $0x70] sm:$0xff]  ;;  %v34_v10 = vld [vmem:[%s2225_s0 + $0x58] sm:$0xff] }
  0xce   :  { %459 = vmatpush.msra.mxu1 %v37_v9 }
  0xcf   :  { %200 = vmax.xlane.f32.xlu0 %v1512_v17 }
  0xd0   :  { %460 = vmatpush.msra.mxu1 %v36_v53 }
  0xd1   :  { %v1710_v35 = vpop.trf.xlu1 }
  0xd2   :  { %v367_v57 = vpop.trf.xlu0 }
  0xd3   :  { %274 = vadd.xlane.f32.xlu2 %v273_v55  ;;  %1231 = vmatmul.msk.f32.gmra.mxu0 %vm382_vm1, %v367_v57  ;;  %v1694_v58 = vpop.eup %1316 }
  0xd4   :  { %v279_v8 = vsel %vm55_vm0, %v1694_v58, 0.0 }
  0xd5   :  { %204 = vmax.xlane.f32.xlu1 %v1516_v18  ;;  %v185_v18 = vadd.f32 %v184_v3, %v183_v56 }
  0xd7   :  { %v186_v4 = vrot.slane %v185_v18, 1 }
  0xdb   :  { %212 = vmax.xlane.f32.xlu2 %v1563_v29  ;;  %v187_v29 = vadd.f32 %v186_v4, %v185_v18 }
  0xdd   :  { %210 = vmax.xlane.f32.xlu1 %v1559_v28  ;;  %1318 = vrcp.f32 %v187_v29  ;;  %v224_v28 = vsub.f32 %v1462_v2, %v195_v50 }
  0xdf   :  { %v242_v11 = vmul.f32 1.442695, %v224_v28 }
  0xe1   :  { %1320 = vpow2.f32 %v242_v11 }
  0xe3   :  { %280 = vadd.xlane.f32.xlu2 %v279_v8  ;;  %v489_v17 = vpop.trf.xlu2  ;;  %v1319_v16 = vpop.eup %1318  ;;  %v33_v8 = vld [vmem:[%s2225_s0 + $0x50] sm:$0xff] }
  0xe7   :  { %v1701_v23 = vpop.eup %1320 }
  0xe8   :  { %v276_v32 = vsel %vm55_vm0, %v1701_v23, 0.0 }
  0xeb   :  { %v490_v62 = vpop.trf.xlu2 }
  0xec   :  { %544 = vperm.xlu0 %1273, %v490_v62  }
  0xf6   :  { %539 = vperm.xlu1 %1274, %v489_v17  }
 0x10c   :  { %505 = vxpose.xlu2.b32.start.end [1/1] (short) (narrow) %v1319_v16, 16 }
 0x116   :  { %277 = vadd.xlane.f32.xlu0 %v276_v32 }
 0x11e   :  { %216 = vmax.xlane.f32.xlu0 %v1582_v36 }
 0x120   :  { %214 = vmax.xlane.f32.xlu1 %v1577_v34 }
 0x126   :  { %218 = vmax.xlane.f32.xlu0 %v1586_v37 }
 0x12e   :  { %220 = vmax.xlane.f32.xlu0 %v1590_v38 }
 0x130   :  { %v207_v39 = vpop.xlane.xlu1 %206 }
 0x131   :  { %v230_v55 = vsub.f32 %v1508_v15, %v207_v39  ;;  %v31_v15 = vld [vmem:[%s2225_s0 + $0x40] sm:$0xff] }
 0x133   :  { %v254_v17 = vmul.f32 1.442695, %v230_v55 }
 0x136   :  { %v199_v2 = vpop.xlane.xlu2 %198 }
 0x137   :  { %v226_v60 = vsub.f32 %v1471_v5, %v199_v2 }
 0x138   :  { %v1717_v45 = vpop.xlane.xlu1 %208 }
 0x139   :  { %v246_v41 = vmul.f32 1.442695, %v226_v60 }
 0x13b   :  { %1322 = vpow2.f32 %v246_v41 }
 0x13e   :  { %v203_v59 = vpop.xlane.xlu2 %202 }
 0x13f   :  { %v228_v63 = vsub.f32 %v1476_v6, %v203_v59 }
 0x140   :  { %v272_v30 = vpop.xlane.xlu1 %271 }
 0x141   :  { %v1715_v36 = vpop.eup %1322  ;;  %v250_v34 = vmul.f32 1.442695, %v228_v63 }
 0x142   :  { %v282_v37 = vsel %vm55_vm0, %v1715_v36, 0.0  ;;  %v201_v7 = vpop.xlane.xlu0 %200 }
 0x143   :  { %1324 = vpow2.f32 %v250_v34  ;;  %283 = vadd.xlane.f32.xlu1 %v282_v37  ;;  %v227_v38 = vsub.f32 %v1496_v12, %v201_v7  ;;  %v231_v37 = vsub.f32 %v1521_v19, %v1717_v45 }
 0x145   :  { %v248_v5 = vmul.f32 1.442695, %v227_v38 }
 0x146   :  { %v275_v0 = vpop.xlane.xlu2 %274 }
 0x147   :  { %1326 = vpow2.f32 %v248_v5 }
 0x148   :  { %v406_v40 = vpop.f32.mrf.mxu0  ;;  %v1730_v43 = vpop.xlane.xlu1 %204  ;;  %1328 = vrcp.f32 %v272_v30 }
 0x149   :  { %v1722_v42 = vpop.eup %1324  ;;  %1330 = vrcp.f32 %v275_v0 }
 0x14a   :  { %v288_v6 = vsel %vm55_vm0, %v1722_v42, 0.0  ;;  %1332 = vpow2.f32 %v254_v17 }
 0x14b   :  { %289 = vadd.xlane.f32.xlu0 %v288_v6  ;;  %v256_v6 = vmul.f32 1.442695, %v231_v37 }
 0x14d   :  { %v1726_v47 = vpop.eup %1326 }
 0x14e   :  { %v285_v14 = vsel %vm55_vm0, %v1726_v47, 0.0  ;;  %v1329_v49 = vpop.eup %1328  ;;  %v1769_v56 = vpop.xlane.xlu2 %212 }
 0x14f   :  { %286 = vadd.xlane.f32.xlu1 %v285_v14  ;;  %v334_v51 = vmul.f32 %v1329_v49, %v1678_v52  ;;  %v35_v52 = vld [vmem:[%s2225_s0 + $0x60] sm:$0xff]  ;;  %v1331_v27 = vpop.eup %1330 }
 0x150   :  { %v409_v44 = vpop.f32.mrf.mxu0  ;;  %v1732_v12 = vpop.xlane.xlu1 %210  ;;  %461 = vmatpush.msra.mxu1 %v35_v52  ;;  %v335_v57 = vmul.f32 %v1331_v27, %v1684_v54 }
 0x151   :  { %v1765_v54 = vpop.eup %1332 }
 0x152   :  { %462 = vmatpush.msra.mxu1 %v34_v10  ;;  %v294_v62 = vsel %vm55_vm0, %v1765_v54, 0.0 }
 0x154   :  { %463 = vmatpush.msra.mxu1 %v33_v8 }
 0x156   :  { %464 = vmatpush.msra.mxu1 %v32_v61  ;;  %v281_v18 = vpop.xlane.xlu2 %280 }
 0x158   :  { %465 = vmatpush.msra.mxu1 %v31_v15 }
 0x159   :  { %1232 = vmatmul.msk.f32.vlgmr.msra.gmra.mxu1 %vm382_vm1, %v1707_v33 }
 0x15e   :  { %v545_v46 = vpop.permute.xlu0 %544 }
 0x15f   :  { %v558_v48 = vmul.f32 %v545_v46, %v409_v44  ;;  %v233_v46 = vsub.f32 %v1531_v21, %v1769_v56 }
 0x161   :  { %599 = vmatpush.msra.mxu2 %v558_v48  ;;  %1233 = vmatmul.msk.f32.gmra.mxu1 %vm382_vm1, %v1710_v35  ;;  %v260_v0 = vmul.f32 1.442695, %v233_v46 }
 0x168   :  { %v540_v50 = vpop.permute.xlu1 %539 }
 0x169   :  { %v557_v22 = vmul.f32 %v540_v50, %v406_v40 }
 0x16b   :  { %600 = vmatpush.msra.mxu2 %v557_v22 }
 0x16c   :  { %1234 = vmatmul.msk.f32.vlgmr.msra.gmra.mxu2 %vm55_vm0, %v334_v51 }
 0x174   :  { %1235 = vmatmul.msk.f32.gmra.mxu2 %vm55_vm0, %v335_v57 }
 0x185   :  { %295 = vadd.xlane.f32.xlu2 %v294_v62 }
 0x189   :  { %v278_v3 = vpop.xlane.xlu0 %277 }
 0x18a   :  { %1334 = vrcp.f32 %v278_v3 }
 0x18b   :  { %1336 = vrcp.f32 %v281_v18 }
 0x190   :  { %v1335_v4 = vpop.eup %1334 }
 0x191   :  { %v336_v29 = vmul.f32 %v1335_v4, %v1701_v23  ;;  %v1337_v28 = vpop.eup %1336  ;;  %v217_v32 = vpop.xlane.xlu0 %216  ;;  %v229_v23 = vsub.f32 %v1501_v13, %v1730_v43 }
 0x192   :  { %v337_v11 = vmul.f32 %v1337_v28, %v1694_v58  ;;  %v235_v50 = vsub.f32 %v1546_v25, %v217_v32 }
 0x193   :  { %1236 = vmatmul.msk.f32.gmra.mxu2 %vm55_vm0, %v336_v29  ;;  %v215_v33 = vpop.xlane.xlu1 %214  ;;  %v252_v58 = vmul.f32 1.442695, %v229_v23 }
 0x194   :  { %v234_v34 = vsub.f32 %v1541_v24, %v215_v33  ;;  %v232_v24 = vsub.f32 %v1526_v20, %v1732_v12  ;;  %v264_v51 = vmul.f32 1.442695, %v235_v50 }
 0x196   :  { %v262_v38 = vmul.f32 1.442695, %v234_v34  ;;  %v258_v43 = vmul.f32 1.442695, %v232_v24 }
 0x199   :  { %v219_v2 = vpop.xlane.xlu0 %218 }
 0x19b   :  { %1237 = vmatmul.msk.f32.gmra.mxu2 %vm55_vm0, %v337_v11 }
 0x1a1   :  { %v221_v39 = vpop.xlane.xlu0 %220 }
 0x1a2   :  { %v237_v9 = vsub.f32 %v1569_v31, %v221_v39 }
 0x1a4   :  { %v268_v52 = vmul.f32 1.442695, %v237_v9 }
 0x1a5   :  { %v521_v16 = vpop.trf.xlu2 }
 0x1a6   :  { %549 = vperm.xlu0 %1273, %v521_v16  }
 0x1ad   :  { %v522_v35 = vpop.trf.xlu2 }
 0x1ae   :  { %554 = vperm.xlu1 %1274, %v522_v35  }
 0x1b6   :  { %v284_v60 = vpop.xlane.xlu1 %283 }
 0x1b7   :  { %1338 = vrcp.f32 %v284_v60 }
 0x1bd   :  { %v1339_v41 = vpop.eup %1338 }
 0x1be   :  { %v338_v59 = vmul.f32 %v1339_v41, %v1715_v36  ;;  %v290_v7 = vpop.xlane.xlu0 %289  ;;  %v236_v36 = vsub.f32 %v1551_v26, %v219_v2  ;;  %v691_v26 = vld [vmem:[%s2226_s2] sm:$0xff] }
 0x1c0   :  { %1238 = vmatmul.msk.f32.gmra.mxu2 %vm55_vm0, %v338_v59  ;;  %v266_v14 = vmul.f32 1.442695, %v236_v36 }
 0x1c2   :  { %v287_v63 = vpop.xlane.xlu1 %286 }
 0x1c3   :  { %1340 = vrcp.f32 %v287_v63 }
 0x1c4   :  { %1342 = vpow2.f32 %v252_v58 }
 0x1c5   :  { %1344 = vrcp.f32 %v290_v7 }
 0x1c6   :  { %1346 = vpow2.f32 %v262_v38 }
 0x1c7   :  { %1348 = vpow2.f32 %v256_v6 }
 0x1c8   :  { %1350 = vpow2.f32 %v266_v14 }
 0x1c9   :  { %v1341_v5 = vpop.eup %1340  ;;  %1352 = vpow2.f32 %v258_v43 }
 0x1ca   :  { %v339_v13 = vmul.f32 %v1341_v5, %v1726_v47  ;;  %v1785_v30 = vpop.eup %1342  ;;  %v692_v47 = vld [vmem:[%s2226_s2 + $0x8] sm:$0xff]  ;;  %1354 = vpow2.f32 %v260_v0  ;;  %v1849_v5 = vld [vmem:[%s2227_s3] ss:$0 sm:$0xff] }
 0x1cb   :  { %v1345_v19 = vpop.eup %1344  ;;  %v291_v45 = vsel %vm55_vm0, %v1785_v30, 0.0  ;;  %759 = vmatpush.msrb.mxu0 %v692_v47  ;;  %1267 = vmatpush.msrb.mxu2 %v692_v47  ;;  %1356 = vpow2.f32 %v264_v51 }
 0x1cc   :  { %1239 = vmatmul.msk.f32.gmra.mxu2 %vm55_vm0, %v339_v13  ;;  %v1799_v40 = vpop.eup %1346  ;;  %v340_v20 = vmul.f32 %v1345_v19, %v1722_v42  ;;  %1266 = vmatpush.msrb.mxu1 %v692_v47  ;;  %1358 = vpow2.f32 %v268_v52 }
 0x1cd   :  { %760 = vmatpush.msrb.mxu0 %v691_v26  ;;  %1269 = vmatpush.msrb.mxu2 %v691_v26  ;;  %v1802_v44 = vpop.eup %1348  ;;  %v306_v12 = vsel %vm55_vm0, %v1799_v40, 0.0 }
 0x1ce   :  { %1268 = vmatpush.msrb.mxu1 %v691_v26  ;;  %v297_v48 = vsel %vm55_vm0, %v1802_v44, 0.0  ;;  %v1811_v42 = vpop.eup %1350 }
 0x1cf   :  { %v1813_v49 = vpop.eup %1352  ;;  %v312_v22 = vsel %vm55_vm0, %v1811_v42, 0.0 }
 0x1d0   :  { %292 = vadd.xlane.f32.xlu0 %v291_v45  ;;  %v300_v21 = vsel %vm55_vm0, %v1813_v49, 0.0  ;;  %v1355_v1 = vpop.eup %1354 }
 0x1d1   :  { %v303_v53 = vsel %vm55_vm0, %v1355_v1, 0.0  ;;  %v1822_v27 = vpop.eup %1356 }
 0x1d2   :  { %v309_v25 = vsel %vm55_vm0, %v1822_v27, 0.0  ;;  %v1827_v57 = vpop.eup %1358 }
 0x1d3   :  { %v315_v10 = vsel %vm55_vm0, %v1827_v57, 0.0 }
 0x1d4   :  { %1240 = vmatmul.msk.f32.gmra.mxu2 %vm55_vm0, %v340_v20 }
 0x1d6   :  { %v467_v8 = vpop.f32.mrf.mxu1 }
 0x1d8   :  { %307 = vadd.xlane.f32.xlu0 %v306_v12  ;;  %298 = vadd.xlane.f32.xlu1 %v297_v48 }
 0x1de   :  { %v470_v62 = vpop.f32.mrf.mxu1 }
 0x1e0   :  { %313 = vadd.xlane.f32.xlu0 %v312_v22  ;;  %301 = vadd.xlane.f32.xlu1 %v300_v21 }
 0x1e8   :  { %304 = vadd.xlane.f32.xlu1 %v303_v53 }
 0x1ef   :  { %v602_v55 = vpop.f32.mrf.mxu2 }
 0x1f0   :  { %310 = vadd.xlane.f32.xlu1 %v309_v25  ;;  %1250 = vmatmul.msk.f32.vlgmr.msrb.gmra.mxu0 %vm55_vm0, %v602_v55 }
 0x1f7   :  { %v605_v31 = vpop.f32.mrf.mxu2 }
 0x1f8   :  { %316 = vadd.xlane.f32.xlu1 %v315_v10  ;;  %1251 = vmatmul.msk.f32.gmra.mxu0 %vm55_vm0, %v605_v31  ;;  %v296_v61 = vpop.xlane.xlu2 %295 }
 0x1f9   :  { %1360 = vrcp.f32 %v296_v61 }
 0x1ff   :  { %v1361_v18 = vpop.eup %1360 }
 0x200   :  { %v342_v28 = vmul.f32 %v1361_v18, %v1765_v54 }
 0x216   :  { %v608_v17 = vpop.f32.mrf.mxu2 }
 0x217   :  { %1252 = vmatmul.msk.f32.gmra.mxu0 %vm55_vm0, %v608_v17 }
 0x218   :  { %v550_v56 = vpop.permute.xlu0 %549 }
 0x219   :  { %v559_v29 = vmul.f32 %v550_v56, %v467_v8 }
 0x21e   :  { %v611_v15 = vpop.f32.mrf.mxu2 }
 0x21f   :  { %1253 = vmatmul.msk.f32.gmra.mxu0 %vm55_vm0, %v611_v15 }
 0x220   :  { %v555_v3 = vpop.permute.xlu1 %554 }
 0x221   :  { %v560_v4 = vmul.f32 %v555_v3, %v470_v62 }
 0x223   :  { %664 = vmatpush.msra.mxu3 %v560_v4 }
 0x225   :  { %665 = vmatpush.msra.mxu3 %v559_v29 }
 0x226   :  { %1242 = vmatmul.msk.f32.vlgmr.msra.gmra.mxu3 %vm55_vm0, %v342_v28 }
 0x243   :  { %v293_v11 = vpop.xlane.xlu0 %292  ;;  %v614_v16 = vpop.f32.mrf.mxu2 }
 0x244   :  { %1362 = vrcp.f32 %v293_v11  ;;  %1254 = vmatmul.msk.f32.gmra.mxu0 %vm55_vm0, %v614_v16 }
 0x24a   :  { %v1363_v32 = vpop.eup %1362 }
 0x24b   :  { %v299_v33 = vpop.xlane.xlu1 %298  ;;  %v341_v35 = vmul.f32 %v1363_v32, %v1785_v30  ;;  %v308_v63 = vpop.xlane.xlu0 %307  ;;  %v1413_v32 = vmov 32.0  }
 0x24c   :  { %1364 = vrcp.f32 %v299_v33 }
 0x24d   :  { %1241 = vmatmul.msk.f32.gmra.mxu2 %vm55_vm0, %v341_v35 }
 0x24f   :  { %v617_v2 = vpop.f32.mrf.mxu2 }
 0x250   :  { %1255 = vmatmul.msk.f32.gmra.mxu0 %vm55_vm0, %v617_v2 }
 0x252   :  { %v1365_v60 = vpop.eup %1364 }
 0x253   :  { %v302_v54 = vpop.xlane.xlu1 %301  ;;  %v343_v39 = vmul.f32 %v1365_v60, %v1802_v44  ;;  %v314_v36 = vpop.xlane.xlu0 %313 }
 0x254   :  { %1366 = vrcp.f32 %v302_v54 }
 0x255   :  { %1243 = vmatmul.msk.f32.gmra.mxu3 %vm55_vm0, %v343_v39 }
 0x257   :  { %v620_v41 = vpop.f32.mrf.mxu2 }
 0x258   :  { %1256 = vmatmul.msk.f32.gmra.mxu0 %vm55_vm0, %v620_v41 }
 0x25a   :  { %v1367_v23 = vpop.eup %1366 }
 0x25b   :  { %v305_v59 = vpop.xlane.xlu1 %304  ;;  %v344_v58 = vmul.f32 %v1367_v23, %v1813_v49 }
 0x25c   :  { %1368 = vrcp.f32 %v305_v59 }
 0x25d   :  { %1244 = vmatmul.msk.f32.gmra.mxu3 %vm55_vm0, %v344_v58  ;;  %1370 = vrcp.f32 %v308_v63 }
 0x262   :  { %v1369_v34 = vpop.eup %1368 }
 0x263   :  { %v345_v37 = vmul.f32 %v1369_v34, %v1355_v1  ;;  %v311_v7 = vpop.xlane.xlu1 %310  ;;  %v1371_v38 = vpop.eup %1370 }
 0x264   :  { %1372 = vrcp.f32 %v311_v7  ;;  %v346_v6 = vmul.f32 %v1371_v38, %v1799_v40 }
 0x265   :  { %1245 = vmatmul.msk.f32.gmra.mxu3 %vm55_vm0, %v345_v37  ;;  %1374 = vrcp.f32 %v314_v36 }
 0x26a   :  { %v1373_v19 = vpop.eup %1372 }
 0x26b   :  { %v347_v45 = vmul.f32 %v1373_v19, %v1822_v27  ;;  %v317_v26 = vpop.xlane.xlu1 %316  ;;  %v1375_v43 = vpop.eup %1374 }
 0x26c   :  { %1376 = vrcp.f32 %v317_v26  ;;  %v348_v20 = vmul.f32 %v1375_v43, %v1811_v42 }
 0x26d   :  { %v762_v13 = vpop.f32.mrf.mxu0  ;;  %1246 = vmatmul.msk.f32.gmra.mxu3 %vm55_vm0, %v346_v6  ;;  %1378 = vrcp.f32 %v1413_v32 }
 0x26e   :  { %v1854_v30 = vadd.f32 %v1849_v5, %v762_v13 }
 0x270   :  { %v813_v24 = vsel %vm812_vm2, %v1854_v30, 0.0 }
 0x271   :  { %814 = vadd.xlane.f32.xlu0 %v813_v24 }
 0x272   :  { %v1377_v44 = vpop.eup %1376 }
 0x273   :  { %v349_v12 = vmul.f32 %v1377_v44, %v1827_v57  ;;  %v1379_v2 = vpop.eup %1378 }
 0x274   :  { %v862_v39 = vmul.f32 32.0, %v1379_v2  ;;  %vm866_vm3 = vweird.f32 %v1379_v2 }
 0x275   :  { %v765_v14 = vpop.f32.mrf.mxu0  ;;  %1247 = vmatmul.msk.f32.gmra.mxu3 %vm55_vm0, %v347_v45 }
 0x276   :  { %v1861_v47 = vadd.f32 %v1849_v5, %v765_v14  ;;  %v863_v41 = vsub.f32 1.0, %v862_v39 }
 0x278   :  { %v816_v40 = vsel %vm812_vm2, %v1861_v47, 0.0  ;;  %v864_v63 = vmul.f32 %v1379_v2, %v863_v41 }
 0x279   :  { %817 = vadd.xlane.f32.xlu1 %v816_v40 }
 0x27a   :  { %v865_v34 = vadd.f32 %v1379_v2, %v864_v63 }
 0x27c   :  { %v1933_v13 = vsel %vm866_vm3, %v1379_v2, %v865_v34 }
 0x27d   :  { %1248 = vmatmul.msk.f32.gmra.mxu3 %vm55_vm0, %v348_v20 }
 0x285   :  { %1249 = vmatmul.msk.f32.gmra.mxu3 %vm55_vm0, %v349_v12 }
 0x294   :  { %v768_v46 = vpop.f32.mrf.mxu0 }
 0x295   :  { %v1870_v48 = vadd.f32 %v1849_v5, %v768_v46 }
 0x297   :  { %v819_v0 = vsel %vm812_vm2, %v1870_v48, 0.0 }
 0x298   :  { %820 = vadd.xlane.f32.xlu0 %v819_v0 }
 0x29c   :  { %v771_v49 = vpop.f32.mrf.mxu0 }
 0x29d   :  { %v1875_v50 = vadd.f32 %v1849_v5, %v771_v49 }
 0x29f   :  { %v822_v42 = vsel %vm812_vm2, %v1875_v50, 0.0 }
 0x2a0   :  { %823 = vadd.xlane.f32.xlu1 %v822_v42 }
 0x2a9   :  { %v667_v27 = vpop.f32.mrf.mxu3 }
 0x2c1   :  { %v774_v22 = vpop.f32.mrf.mxu0 }
 0x2c2   :  { %v1880_v21 = vadd.f32 %v1849_v5, %v774_v22 }
 0x2c4   :  { %v825_v51 = vsel %vm812_vm2, %v1880_v21, 0.0 }
 0x2c5   :  { %826 = vadd.xlane.f32.xlu0 %v825_v51 }
 0x2cd   :  { %v777_v1 = vpop.f32.mrf.mxu0 }
 0x2ce   :  { %v1885_v9 = vadd.f32 %v1849_v5, %v777_v1 }
 0x2d0   :  { %v623_v53 = vpop.f32.mrf.mxu2  ;;  %v828_v52 = vsel %vm812_vm2, %v1885_v9, 0.0 }
 0x2d1   :  { %1257 = vmatmul.msk.f32.vlgmr.msrb.gmra.mxu1 %vm55_vm0, %v623_v53  ;;  %829 = vadd.xlane.f32.xlu2 %v828_v52 }
 0x2d5   :  { %v780_v25 = vpop.f32.mrf.mxu0 }
 0x2d6   :  { %v1891_v55 = vadd.f32 %v1849_v5, %v780_v25 }
 0x2d8   :  { %v831_v57 = vsel %vm812_vm2, %v1891_v55, 0.0  ;;  %v670_v10 = vpop.f32.mrf.mxu3 }
 0x2d9   :  { %1258 = vmatmul.msk.f32.gmra.mxu1 %vm55_vm0, %v667_v27  ;;  %832 = vadd.xlane.f32.xlu1 %v831_v57 }
 0x2e0   :  { %v673_v31 = vpop.f32.mrf.mxu3 }
 0x2e1   :  { %1259 = vmatmul.msk.f32.gmra.mxu1 %vm55_vm0, %v670_v10 }
 0x2e4   :  { %v815_v38 = vpop.xlane.xlu0 %814 }
 0x2e5   :  { %v868_v24 = vmul.f32 %v1933_v13, %v815_v38 }
 0x2e7   :  { %v1940_v14 = vsub.f32 %v1854_v30, %v868_v24 }
 0x2e8   :  { %v676_v8 = vpop.f32.mrf.mxu3 }
 0x2e9   :  { %1260 = vmatmul.msk.f32.gmra.mxu1 %vm55_vm0, %v673_v31  ;;  %v900_v46 = vmul.f32 %v1940_v14, %v1940_v14 }
 0x2eb   :  { %v916_v51 = vsel %vm812_vm2, %v900_v46, 0.0 }
 0x2ec   :  { %v818_v36 = vpop.xlane.xlu1 %817 }
 0x2ed   :  { %v869_v20 = vmul.f32 %v1933_v13, %v818_v36 }
 0x2ef   :  { %v1952_v30 = vsub.f32 %v1861_v47, %v869_v20 }
 0x2f0   :  { %v679_v17 = vpop.f32.mrf.mxu3 }
 0x2f1   :  { %1261 = vmatmul.msk.f32.gmra.mxu1 %vm55_vm0, %v676_v8  ;;  %v901_v47 = vmul.f32 %v1952_v30, %v1952_v30 }
 0x2f8   :  { %v682_v61 = vpop.f32.mrf.mxu3 }
 0x2f9   :  { %1262 = vmatmul.msk.f32.gmra.mxu1 %vm55_vm0, %v679_v17  ;;  %v919_v17 = vsel %vm812_vm2, %v901_v47, 0.0 }
 0x300   :  { %v685_v15 = vpop.f32.mrf.mxu3 }
 0x301   :  { %1263 = vmatmul.msk.f32.gmra.mxu1 %vm55_vm0, %v682_v61  ;;  %1264 = vmatmul.msk.f32.vlgmr.msrb.gmra.mxu2 %vm55_vm0, %v685_v15 }
 0x308   :  { %v688_v62 = vpop.f32.mrf.mxu3 }
 0x309   :  { %1265 = vmatmul.msk.f32.gmra.mxu2 %vm55_vm0, %v688_v62 }
 0x30b   :  { %v821_v26 = vpop.xlane.xlu0 %820 }
 0x30c   :  { %v870_v53 = vmul.f32 %v1933_v13, %v821_v26 }
 0x30e   :  { %v1971_v10 = vsub.f32 %v1870_v48, %v870_v53 }
 0x313   :  { %v824_v43 = vpop.xlane.xlu1 %823 }
 0x314   :  { %v871_v44 = vmul.f32 %v1933_v13, %v824_v43 }
 0x316   :  { %v1957_v42 = vsub.f32 %v1875_v50, %v871_v44 }
 0x318   :  { %v903_v50 = vmul.f32 %v1957_v42, %v1957_v42 }
 0x338   :  { %v827_v22 = vpop.xlane.xlu0 %826 }
 0x339   :  { %v872_v52 = vmul.f32 %v1933_v13, %v827_v22 }
 0x33b   :  { %v1974_v31 = vsub.f32 %v1880_v21, %v872_v52  ;;  %v902_v21 = vmul.f32 %v1971_v10, %v1971_v10 }
 0x33d   :  { %v904_v62 = vmul.f32 %v1974_v31, %v1974_v31 }
 0x344   :  { %v830_v61 = vpop.xlane.xlu2 %829 }
 0x345   :  { %v873_v48 = vmul.f32 %v1933_v13, %v830_v61 }
 0x34c   :  { %v833_v1 = vpop.xlane.xlu1 %832 }
 0x34d   :  { %v874_v27 = vmul.f32 %v1933_v13, %v833_v1 }
 0x34e   :  { %v783_v56 = vpop.f32.mrf.mxu1 }
 0x34f   :  { %v1904_v3 = vadd.f32 %v1849_v5, %v783_v56  ;;  %v1980_v15 = vsub.f32 %v1891_v55, %v874_v27  ;;  %v922_v55 = vsel %vm812_vm2, %v902_v21, 0.0 }
 0x351   :  { %v834_v18 = vsel %vm812_vm2, %v1904_v3, 0.0  ;;  %v906_v56 = vmul.f32 %v1980_v15, %v1980_v15 }
 0x352   :  { %835 = vadd.xlane.f32.xlu0 %v834_v18  ;;  %v1991_v18 = vsub.f32 %v1885_v9, %v873_v48 }
 0x356   :  { %v786_v4 = vpop.f32.mrf.mxu1 }
 0x357   :  { %v1909_v29 = vadd.f32 %v1849_v5, %v786_v4  ;;  %v928_v4 = vsel %vm812_vm2, %v904_v62, 0.0 }
 0x359   :  { %v837_v28 = vsel %vm812_vm2, %v1909_v29, 0.0 }
 0x35a   :  { %838 = vadd.xlane.f32.xlu2 %v837_v28  ;;  %v934_v28 = vsel %vm812_vm2, %v906_v56, 0.0 }
 0x35e   :  { %v789_v11 = vpop.f32.mrf.mxu1 }
 0x35f   :  { %v1914_v16 = vadd.f32 %v1849_v5, %v789_v11  ;;  %v905_v11 = vmul.f32 %v1991_v18, %v1991_v18 }
 0x361   :  { %v840_v33 = vsel %vm812_vm2, %v1914_v16, 0.0  ;;  %v931_v32 = vsel %vm812_vm2, %v905_v11, 0.0 }
 0x362   :  { %841 = vadd.xlane.f32.xlu1 %v840_v33 }
 0x366   :  { %v792_v35 = vpop.f32.mrf.mxu1 }
 0x367   :  { %v1919_v60 = vadd.f32 %v1849_v5, %v792_v35 }
 0x369   :  { %v843_v54 = vsel %vm812_vm2, %v1919_v60, 0.0 }
 0x36a   :  { %844 = vadd.xlane.f32.xlu0 %v843_v54 }
 0x36e   :  { %v795_v23 = vpop.f32.mrf.mxu1 }
 0x36f   :  { %v1924_v59 = vadd.f32 %v1849_v5, %v795_v23 }
 0x371   :  { %v846_v58 = vsel %vm812_vm2, %v1924_v59, 0.0 }
 0x372   :  { %847 = vadd.xlane.f32.xlu2 %v846_v58 }
 0x376   :  { %v798_v37 = vpop.f32.mrf.mxu1 }
 0x377   :  { %v1929_v7 = vadd.f32 %v1849_v5, %v798_v37 }
 0x379   :  { %v849_v6 = vsel %vm812_vm2, %v1929_v7, 0.0 }
 0x37a   :  { %850 = vadd.xlane.f32.xlu1 %v849_v6 }
 0x37e   :  { %v801_v19 = vpop.f32.mrf.mxu1 }
 0x37f   :  { %v1937_v45 = vadd.f32 %v1849_v5, %v801_v19 }
 0x381   :  { %v852_v40 = vsel %vm812_vm2, %v1937_v45, 0.0 }
 0x382   :  { %853 = vadd.xlane.f32.xlu0 %v852_v40 }
 0x384   :  { %v804_v12 = vpop.f32.mrf.mxu2 }
 0x385   :  { %v1949_v0 = vadd.f32 %v1849_v5, %v804_v12 }
 0x387   :  { %v855_v49 = vsel %vm812_vm2, %v1949_v0, 0.0 }
 0x388   :  { %856 = vadd.xlane.f32.xlu2 %v855_v49 }
 0x38a   :  { %917 = vadd.xlane.f32.xlu0 %v916_v51 }
 0x38c   :  { %v807_v25 = vpop.f32.mrf.mxu2 }
 0x38d   :  { %v1968_v57 = vadd.f32 %v1849_v5, %v807_v25  ;;  %v925_v5 = vsel %vm812_vm2, %v903_v50, 0.0 }
 0x38f   :  { %v858_v8 = vsel %vm812_vm2, %v1968_v57, 0.0 }
 0x390   :  { %859 = vadd.xlane.f32.xlu1 %v858_v8  ;;  %920 = vadd.xlane.f32.xlu2 %v919_v17 }
 0x392   :  { %926 = vadd.xlane.f32.xlu0 %v925_v5 }
 0x398   :  { %923 = vadd.xlane.f32.xlu1 %v922_v55  ;;  %929 = vadd.xlane.f32.xlu2 %v928_v4 }
 0x39a   :  { %935 = vadd.xlane.f32.xlu0 %v934_v28 }
 0x3a0   :  { %932 = vadd.xlane.f32.xlu1 %v931_v32 }
 0x3c5   :  { %v836_v33 = vpop.xlane.xlu0 %835 }
 0x3c6   :  { %v875_v35 = vmul.f32 %v1933_v13, %v836_v33 }
 0x3c8   :  { %v2001_v9 = vsub.f32 %v1904_v3, %v875_v35 }
 0x3ca   :  { %v907_v2 = vmul.f32 %v2001_v9, %v2001_v9 }
 0x3cc   :  { %v937_v54 = vsel %vm812_vm2, %v907_v2, 0.0 }
 0x3cd   :  { %v839_v39 = vpop.xlane.xlu2 %838  ;;  %938 = vadd.xlane.f32.xlu2 %v937_v54 }
 0x3ce   :  { %v876_v41 = vmul.f32 %v1933_v13, %v839_v39 }
 0x3d0   :  { %v2008_v23 = vsub.f32 %v1909_v29, %v876_v41 }
 0x3d2   :  { %v908_v58 = vmul.f32 %v2008_v23, %v2008_v23 }
 0x3d4   :  { %v940_v63 = vsel %vm812_vm2, %v908_v58, 0.0 }
 0x3d5   :  { %v842_v34 = vpop.xlane.xlu1 %841  ;;  %941 = vadd.xlane.f32.xlu1 %v940_v63 }
 0x3d6   :  { %v877_v3 = vmul.f32 %v1933_v13, %v842_v34 }
 0x3d8   :  { %v2015_v37 = vsub.f32 %v1914_v16, %v877_v3 }
 0x3da   :  { %v909_v38 = vmul.f32 %v2015_v37, %v2015_v37 }
 0x3dc   :  { %v943_v6 = vsel %vm812_vm2, %v909_v38, 0.0 }
 0x3dd   :  { %944 = vadd.xlane.f32.xlu0 %v943_v6  ;;  %v845_v29 = vpop.xlane.xlu0 %844 }
 0x3de   :  { %v878_v36 = vmul.f32 %v1933_v13, %v845_v29 }
 0x3e0   :  { %v2022_v24 = vsub.f32 %v1919_v60, %v878_v36 }
 0x3e2   :  { %v910_v19 = vmul.f32 %v2022_v24, %v2022_v24 }
 0x3e4   :  { %v946_v26 = vsel %vm812_vm2, %v910_v19, 0.0 }
 0x3e5   :  { %v848_v40 = vpop.xlane.xlu2 %847  ;;  %947 = vadd.xlane.f32.xlu2 %v946_v26 }
 0x3e6   :  { %v879_v16 = vmul.f32 %v1933_v13, %v848_v40 }
 0x3e8   :  { %v2029_v43 = vsub.f32 %v1924_v59, %v879_v16  ;;  %v2078_v16 = vld [vmem:[%s2228_s4] ss:$0 sm:$0xff] }
 0x3ea   :  { %v911_v20 = vmul.f32 %v2029_v43, %v2029_v43 }
 0x3ec   :  { %v949_v44 = vsel %vm812_vm2, %v911_v20, 0.0 }
 0x3ed   :  { %v851_v12 = vpop.xlane.xlu1 %850  ;;  %950 = vadd.xlane.f32.xlu1 %v949_v44 }
 0x3ee   :  { %v880_v60 = vmul.f32 %v1933_v13, %v851_v12 }
 0x3f0   :  { %v2036_v46 = vsub.f32 %v1929_v7, %v880_v60  ;;  %v2085_v60 = vld [vmem:[%s2229_s5] ss:$0 sm:$0xff] }
 0x3f2   :  { %v912_v49 = vmul.f32 %v2036_v46, %v2036_v46 }
 0x3f4   :  { %v952_v22 = vsel %vm812_vm2, %v912_v49, 0.0 }
 0x3f5   :  { %953 = vadd.xlane.f32.xlu0 %v952_v22  ;;  %v854_v59 = vpop.xlane.xlu0 %853 }
 0x3f6   :  { %v881_v51 = vmul.f32 %v1933_v13, %v854_v59 }
 0x3f8   :  { %v2043_v1 = vsub.f32 %v1937_v45, %v881_v51 }
 0x3fa   :  { %v913_v53 = vmul.f32 %v2043_v1, %v2043_v1 }
 0x3fb   :  { %v857_v52 = vpop.xlane.xlu2 %856 }
 0x3fc   :  { %v955_v47 = vsel %vm812_vm2, %v913_v53, 0.0  ;;  %v882_v7 = vmul.f32 %v1933_v13, %v857_v52 }
 0x3fd   :  { %956 = vadd.xlane.f32.xlu2 %v955_v47  ;;  %v918_v27 = vpop.xlane.xlu0 %917 }
 0x3fe   :  { %v964_v25 = vmul.f32 %v918_v27, %v1933_v13  ;;  %v2051_v50 = vsub.f32 %v1949_v0, %v882_v7 }
 0x400   :  { %v980_v8 = vadd.f32 1e-05, %v964_v25  ;;  %v914_v45 = vmul.f32 %v2051_v50, %v2051_v50 }
 0x402   :  { %1380 = vrsqrt.f32 %v980_v8  ;;  %v958_v17 = vsel %vm812_vm2, %v914_v45, 0.0  ;;  %vm1002_vm5 = vweird.f32 %v980_v8 }
 0x403   :  { %v860_v61 = vpop.xlane.xlu1 %859  ;;  %959 = vadd.xlane.f32.xlu1 %v958_v17  ;;  %v921_v5 = vpop.xlane.xlu2 %920 }
 0x404   :  { %v883_v48 = vmul.f32 %v1933_v13, %v860_v61  ;;  %v965_v21 = vmul.f32 %v921_v5, %v1933_v13 }
 0x405   :  { %v927_v62 = vpop.xlane.xlu0 %926 }
 0x406   :  { %v967_v56 = vmul.f32 %v927_v62, %v1933_v13  ;;  %v2060_v0 = vsub.f32 %v1968_v57, %v883_v48  ;;  %v981_v55 = vadd.f32 1e-05, %v965_v21 }
 0x408   :  { %v1381_v4 = vpop.eup %1380  ;;  %v983_v28 = vadd.f32 1e-05, %v967_v56  ;;  %1382 = vrsqrt.f32 %v981_v55  ;;  %v915_v32 = vmul.f32 %v2060_v0, %v2060_v0  ;;  %vm1012_vm9 = vweird.f32 %v981_v55 }
 0x409   :  { %v997_v11 = vmul.f32 %v1381_v4, %v980_v8  ;;  %vm1003_vm4 = vweird.f32 %v1381_v4 }
 0x40a   :  { %1384 = vrsqrt.f32 %v983_v28  ;;  %v961_v54 = vsel %vm812_vm2, %v915_v32, 0.0  ;;  %vm1004_vm6 = vmor %vm1002_vm5, %vm1003_vm4  ;;  %vm1032_vm11 = vweird.f32 %v983_v28 }
 0x40b   :  { %v998_v33 = vmul.f32 %v1381_v4, %v997_v11  ;;  %v924_v35 = vpop.xlane.xlu1 %923  ;;  %v930_v2 = vpop.xlane.xlu2 %929  ;;  %962 = vadd.xlane.f32.xlu0 %v961_v54 }
 0x40c   :  { %v966_v41 = vmul.f32 %v924_v35, %v1933_v13  ;;  %v968_v57 = vmul.f32 %v930_v2, %v1933_v13 }
 0x40d   :  { %v999_v39 = vmul.f32 0.5, %v998_v33  ;;  %v936_v58 = vpop.xlane.xlu0 %935 }
 0x40e   :  { %v970_v63 = vmul.f32 %v936_v58, %v1933_v13  ;;  %v1383_v34 = vpop.eup %1382  ;;  %v2068_v38 = vadd.f32 1e-05, %v966_v41  ;;  %v2070_v6 = vadd.f32 1e-05, %v968_v57 }
 0x40f   :  { %v1000_v3 = vsub.f32 1.5, %v999_v39  ;;  %v1007_v36 = vmul.f32 %v1383_v34, %v981_v55  ;;  %vm1013_vm7 = vweird.f32 %v1383_v34 }
 0x410   :  { %v1385_v29 = vpop.eup %1384  ;;  %v2072_v19 = vadd.f32 1e-05, %v970_v63  ;;  %1386 = vrsqrt.f32 %v2068_v38  ;;  %vm1014_vm10 = vmor %vm1012_vm9, %vm1013_vm7  ;;  %vm1022_vm13 = vweird.f32 %v2068_v38  ;;  %vm1042_vm3 = vweird.f32 %v2070_v6 }
 0x411   :  { %v1001_v26 = vmul.f32 %v1381_v4, %v1000_v3  ;;  %v1027_v40 = vmul.f32 %v1385_v29, %v983_v28  ;;  %v1008_v20 = vmul.f32 %v1383_v34, %v1007_v36  ;;  %1388 = vrsqrt.f32 %v2070_v6 }
 0x412   :  { %1390 = vrsqrt.f32 %v2072_v19  ;;  %vm1033_vm8 = vweird.f32 %v1385_v29  ;;  %vm1062_vm5 = vweird.f32 %v2072_v19 }
 0x413   :  { %v1005_v44 = vsel %vm1004_vm6, %v1381_v4, %v1001_v26  ;;  %v1028_v12 = vmul.f32 %v1385_v29, %v1027_v40  ;;  %v1009_v22 = vmul.f32 0.5, %v1008_v20  ;;  %v933_v59 = vpop.xlane.xlu1 %932  ;;  %vm1034_vm12 = vmor %vm1032_vm11, %vm1033_vm8 }
 0x414   :  { %v1156_v49 = vmul.f32 %v1005_v44, %v1940_v14  ;;  %v969_v53 = vmul.f32 %v933_v59, %v1933_v13 }
 0x415   :  { %v1029_v51 = vmul.f32 0.5, %v1028_v12  ;;  %v1010_v47 = vsub.f32 1.5, %v1009_v22 }
 0x416   :  { %v1175_v52 = vmul.f32 %v2078_v16, %v1156_v49  ;;  %v1387_v7 = vpop.eup %1386  ;;  %v2090_v25 = vadd.f32 1e-05, %v969_v53 }
 0x417   :  { %v1030_v27 = vsub.f32 1.5, %v1029_v51  ;;  %v1389_v8 = vpop.eup %1388  ;;  %v1011_v17 = vmul.f32 %v1383_v34, %v1010_v47  ;;  %v1017_v14 = vmul.f32 %v1387_v7, %v2068_v38  ;;  %vm1023_vm14 = vweird.f32 %v1387_v7 }
 0x418   :  { %v1194_v45 = vadd.f32 %v2085_v60, %v1175_v52  ;;  %v1391_v61 = vpop.eup %1390  ;;  %v1037_v48 = vmul.f32 %v1389_v8, %v2070_v6  ;;  %1392 = vrsqrt.f32 %v2090_v25  ;;  %vm1043_vm15 = vweird.f32 %v1389_v8  ;;  %vm1024_vm1 = vmor %vm1022_vm13, %vm1023_vm14 }
 0x419   :  { %v1031_v5 = vmul.f32 %v1385_v29, %v1030_v27  ;;  %v1015_v21 = vsel %vm1014_vm10, %v1383_v34, %v1011_v17  ;;  %v1018_v62 = vmul.f32 %v1387_v7, %v1017_v14  ;;  %v1057_v56 = vmul.f32 %v1391_v61, %v2072_v19  ;;  %vm1044_vm4 = vmor %vm1042_vm3, %vm1043_vm15 }
 0x41a   :  { %1210 = vst.msk [vmem:[%s2230_s6] sm:$0xff] %vm812_vm2, %v1194_v45  ;;  %v1157_v55 = vmul.f32 %v1015_v21, %v1952_v30  ;;  %v1038_v11 = vmul.f32 %v1389_v8, %v1037_v48  ;;  %vm1063_vm0 = vweird.f32 %v1391_v61  ;;  %vm1052_vm8 = vweird.f32 %v2090_v25 }
 0x41b   :  { %v1035_v4 = vsel %vm1034_vm12, %v1385_v29, %v1031_v5  ;;  %v1019_v32 = vmul.f32 0.5, %v1018_v62  ;;  %v1058_v33 = vmul.f32 %v1391_v61, %v1057_v56  ;;  %vm1064_vm6 = vmor %vm1062_vm5, %vm1063_vm0 }
 0x41c   :  { %v1159_v28 = vmul.f32 %v1035_v4, %v1957_v42  ;;  %v1176_v35 = vmul.f32 %v2078_v16, %v1157_v55  ;;  %v1039_v2 = vmul.f32 0.5, %v1038_v11 }
 0x41d   :  { %v1020_v39 = vsub.f32 1.5, %v1019_v32  ;;  %v1059_v41 = vmul.f32 0.5, %v1058_v33 }
 0x41e   :  { %v1178_v54 = vmul.f32 %v2078_v16, %v1159_v28  ;;  %v1393_v57 = vpop.eup %1392  ;;  %v1195_v58 = vadd.f32 %v2085_v60, %v1176_v35  ;;  %v1040_v30 = vsub.f32 1.5, %v1039_v2 }
 0x41f   :  { %v1021_v63 = vmul.f32 %v1387_v7, %v1020_v39  ;;  %v1060_v34 = vsub.f32 1.5, %v1059_v41  ;;  %v1047_v3 = vmul.f32 %v1393_v57, %v2090_v25  ;;  %vm1053_vm7 = vweird.f32 %v1393_v57 }
 0x420   :  { %v1197_v42 = vadd.f32 %v2085_v60, %v1178_v54  ;;  %1211 = vst.msk [vmem:[%s2230_s6 + $0x8] sm:$0xff] %vm812_vm2, %v1195_v58  ;;  %v1041_v29 = vmul.f32 %v1389_v8, %v1040_v30  ;;  %vm1054_vm9 = vmor %vm1052_vm8, %vm1053_vm7 }
 0x421   :  { %v1025_v36 = vsel %vm1024_vm1, %v1387_v7, %v1021_v63  ;;  %v1061_v26 = vmul.f32 %v1391_v61, %v1060_v34  ;;  %v1048_v40 = vmul.f32 %v1393_v57, %v1047_v3 }
 0x422   :  { %1213 = vst.msk [vmem:[%s2230_s6 + $0x18] sm:$0xff] %vm812_vm2, %v1197_v42  ;;  %v1158_v20 = vmul.f32 %v1025_v36, %v1971_v10  ;;  %v1045_v44 = vsel %vm1044_vm4, %v1389_v8, %v1041_v29 }
 0x423   :  { %v1160_v38 = vmul.f32 %v1045_v44, %v1974_v31  ;;  %v1065_v12 = vsel %vm1064_vm6, %v1391_v61, %v1061_v26  ;;  %v1049_v6 = vmul.f32 0.5, %v1048_v40 }
 0x424   :  { %v1177_v49 = vmul.f32 %v2078_v16, %v1158_v20  ;;  %v1162_v22 = vmul.f32 %v1065_v12, %v1980_v15 }
 0x425   :  { %v1179_v59 = vmul.f32 %v2078_v16, %v1160_v38  ;;  %v1050_v51 = vsub.f32 1.5, %v1049_v6 }
 0x426   :  { %v1196_v19 = vadd.f32 %v2085_v60, %v1177_v49  ;;  %v1181_v53 = vmul.f32 %v2078_v16, %v1162_v22 }
 0x427   :  { %v1198_v10 = vadd.f32 %v2085_v60, %v1179_v59  ;;  %v1051_v52 = vmul.f32 %v1393_v57, %v1050_v51 }
 0x428   :  { %1212 = vst.msk [vmem:[%s2230_s6 + $0x10] sm:$0xff] %vm812_vm2, %v1196_v19  ;;  %v1200_v31 = vadd.f32 %v2085_v60, %v1181_v53 }
 0x429   :  { %1214 = vst.msk [vmem:[%s2230_s6 + $0x20] sm:$0xff] %vm812_vm2, %v1198_v10  ;;  %v1055_v15 = vsel %vm1054_vm9, %v1393_v57, %v1051_v52 }
 0x42a   :  { %1216 = vst.msk [vmem:[%s2230_s6 + $0x30] sm:$0xff] %vm812_vm2, %v1200_v31  ;;  %v1161_v47 = vmul.f32 %v1055_v15, %v1991_v18 }
 0x42c   :  { %v1180_v7 = vmul.f32 %v2078_v16, %v1161_v47 }
 0x42e   :  { %v1199_v27 = vadd.f32 %v2085_v60, %v1180_v7 }
 0x430   :  { %1215 = vst.msk [vmem:[%s2230_s6 + $0x28] sm:$0xff] %vm812_vm2, %v1199_v27 }
 0x440   :  { %v939_v25 = vpop.xlane.xlu2 %938 }
 0x441   :  { %v971_v8 = vmul.f32 %v939_v25, %v1933_v13 }
 0x443   :  { %v987_v45 = vadd.f32 1e-05, %v971_v8 }
 0x445   :  { %1394 = vrsqrt.f32 %v987_v45  ;;  %vm1072_vm11 = vweird.f32 %v987_v45 }
 0x448   :  { %v942_v17 = vpop.xlane.xlu1 %941 }
 0x449   :  { %v972_v14 = vmul.f32 %v942_v17, %v1933_v13 }
 0x44b   :  { %v1395_v61 = vpop.eup %1394  ;;  %v988_v5 = vadd.f32 1e-05, %v972_v14 }
 0x44c   :  { %v1067_v18 = vmul.f32 %v1395_v61, %v987_v45  ;;  %vm1073_vm10 = vweird.f32 %v1395_v61 }
 0x44d   :  { %1396 = vrsqrt.f32 %v988_v5  ;;  %vm1074_vm12 = vmor %vm1072_vm11, %vm1073_vm10  ;;  %vm1082_vm14 = vweird.f32 %v988_v5 }
 0x44e   :  { %v1068_v48 = vmul.f32 %v1395_v61, %v1067_v18 }
 0x450   :  { %v1069_v21 = vmul.f32 0.5, %v1068_v48  ;;  %v945_v62 = vpop.xlane.xlu0 %944 }
 0x451   :  { %v973_v56 = vmul.f32 %v945_v62, %v1933_v13 }
 0x452   :  { %v1070_v55 = vsub.f32 1.5, %v1069_v21 }
 0x453   :  { %v1397_v4 = vpop.eup %1396  ;;  %v989_v11 = vadd.f32 1e-05, %v973_v56 }
 0x454   :  { %v1071_v28 = vmul.f32 %v1395_v61, %v1070_v55  ;;  %v1077_v32 = vmul.f32 %v1397_v4, %v988_v5  ;;  %vm1083_vm13 = vweird.f32 %v1397_v4 }
 0x455   :  { %1398 = vrsqrt.f32 %v989_v11  ;;  %vm1084_vm15 = vmor %vm1082_vm14, %vm1083_vm13  ;;  %vm1092_vm1 = vweird.f32 %v989_v11 }
 0x456   :  { %v1075_v33 = vsel %vm1074_vm12, %v1395_v61, %v1071_v28  ;;  %v1078_v35 = vmul.f32 %v1397_v4, %v1077_v32 }
 0x457   :  { %v1163_v2 = vmul.f32 %v1075_v33, %v2001_v9 }
 0x458   :  { %v1079_v54 = vmul.f32 0.5, %v1078_v35  ;;  %v948_v39 = vpop.xlane.xlu2 %947 }
 0x459   :  { %v1182_v41 = vmul.f32 %v2078_v16, %v1163_v2  ;;  %v974_v57 = vmul.f32 %v948_v39, %v1933_v13 }
 0x45a   :  { %v1080_v58 = vsub.f32 1.5, %v1079_v54 }
 0x45b   :  { %v1399_v30 = vpop.eup %1398  ;;  %v1201_v42 = vadd.f32 %v2085_v60, %v1182_v41  ;;  %v990_v63 = vadd.f32 1e-05, %v974_v57 }
 0x45c   :  { %v1081_v34 = vmul.f32 %v1397_v4, %v1080_v58  ;;  %v1087_v3 = vmul.f32 %v1399_v30, %v989_v11  ;;  %vm1093_vm0 = vweird.f32 %v1399_v30 }
 0x45d   :  { %1217 = vst.msk [vmem:[%s2230_s6 + $0x38] sm:$0xff] %vm812_vm2, %v1201_v42  ;;  %1400 = vrsqrt.f32 %v990_v63  ;;  %vm1094_vm3 = vmor %vm1092_vm1, %vm1093_vm0  ;;  %vm1102_vm5 = vweird.f32 %v990_v63 }
 0x45e   :  { %v1085_v9 = vsel %vm1084_vm15, %v1397_v4, %v1081_v34  ;;  %v1088_v29 = vmul.f32 %v1399_v30, %v1087_v3 }
 0x45f   :  { %v1164_v36 = vmul.f32 %v1085_v9, %v2008_v23 }
 0x460   :  { %v1089_v26 = vmul.f32 0.5, %v1088_v29  ;;  %v951_v40 = vpop.xlane.xlu1 %950 }
 0x461   :  { %v1183_v20 = vmul.f32 %v2078_v16, %v1164_v36  ;;  %v975_v44 = vmul.f32 %v951_v40, %v1933_v13 }
 0x462   :  { %v1090_v38 = vsub.f32 1.5, %v1089_v26 }
 0x463   :  { %v1401_v12 = vpop.eup %1400  ;;  %v1202_v6 = vadd.f32 %v2085_v60, %v1183_v20  ;;  %v991_v49 = vadd.f32 1e-05, %v975_v44 }
 0x464   :  { %v1091_v22 = vmul.f32 %v1399_v30, %v1090_v38  ;;  %v1097_v59 = vmul.f32 %v1401_v12, %v990_v63  ;;  %vm1103_vm4 = vweird.f32 %v1401_v12 }
 0x465   :  { %1218 = vst.msk [vmem:[%s2230_s6 + $0x40] sm:$0xff] %vm812_vm2, %v1202_v6  ;;  %1402 = vrsqrt.f32 %v991_v49  ;;  %vm1104_vm6 = vmor %vm1102_vm5, %vm1103_vm4  ;;  %vm1112_vm8 = vweird.f32 %v991_v49 }
 0x466   :  { %v1095_v23 = vsel %vm1094_vm3, %v1399_v30, %v1091_v22  ;;  %v1098_v51 = vmul.f32 %v1401_v12, %v1097_v59 }
 0x467   :  { %v1165_v19 = vmul.f32 %v1095_v23, %v2015_v37 }
 0x468   :  { %v1099_v53 = vmul.f32 0.5, %v1098_v51  ;;  %v954_v10 = vpop.xlane.xlu0 %953 }
 0x469   :  { %v1184_v52 = vmul.f32 %v2078_v16, %v1165_v19  ;;  %v976_v31 = vmul.f32 %v954_v10, %v1933_v13 }
 0x46a   :  { %v1100_v15 = vsub.f32 1.5, %v1099_v53 }
 0x46b   :  { %v1403_v47 = vpop.eup %1402  ;;  %v1203_v7 = vadd.f32 %v2085_v60, %v1184_v52  ;;  %v992_v27 = vadd.f32 1e-05, %v976_v31 }
 0x46c   :  { %v1101_v25 = vmul.f32 %v1401_v12, %v1100_v15  ;;  %v1107_v8 = vmul.f32 %v1403_v47, %v991_v49  ;;  %vm1113_vm7 = vweird.f32 %v1403_v47 }
 0x46d   :  { %1219 = vst.msk [vmem:[%s2230_s6 + $0x48] sm:$0xff] %vm812_vm2, %v1203_v7  ;;  %1404 = vrsqrt.f32 %v992_v27  ;;  %vm1114_vm9 = vmor %vm1112_vm8, %vm1113_vm7  ;;  %vm1122_vm11 = vweird.f32 %v992_v27 }
 0x46e   :  { %v1105_v37 = vsel %vm1104_vm6, %v1401_v12, %v1101_v25  ;;  %v1108_v45 = vmul.f32 %v1403_v47, %v1107_v8 }
 0x46f   :  { %v1166_v17 = vmul.f32 %v1105_v37, %v2022_v24 }
 0x470   :  { %v1109_v14 = vmul.f32 0.5, %v1108_v45  ;;  %v957_v61 = vpop.xlane.xlu2 %956 }
 0x471   :  { %v1185_v5 = vmul.f32 %v2078_v16, %v1166_v17  ;;  %v977_v18 = vmul.f32 %v957_v61, %v1933_v13 }
 0x472   :  { %v1110_v48 = vsub.f32 1.5, %v1109_v14 }
 0x473   :  { %v1405_v21 = vpop.eup %1404  ;;  %v1204_v62 = vadd.f32 %v2085_v60, %v1185_v5  ;;  %v993_v56 = vadd.f32 1e-05, %v977_v18 }
 0x474   :  { %v1111_v55 = vmul.f32 %v1403_v47, %v1110_v48  ;;  %v1117_v4 = vmul.f32 %v1405_v21, %v992_v27  ;;  %vm1123_vm10 = vweird.f32 %v1405_v21 }
 0x475   :  { %1220 = vst.msk [vmem:[%s2230_s6 + $0x50] sm:$0xff] %vm812_vm2, %v1204_v62  ;;  %1406 = vrsqrt.f32 %v993_v56  ;;  %vm1124_vm12 = vmor %vm1122_vm11, %vm1123_vm10  ;;  %vm1132_vm14 = vweird.f32 %v993_v56 }
 0x476   :  { %v1115_v24 = vsel %vm1114_vm9, %v1403_v47, %v1111_v55  ;;  %v1118_v11 = vmul.f32 %v1405_v21, %v1117_v4  ;;  %v960_v32 = vpop.xlane.xlu1 %959 }
 0x477   :  { %v1167_v28 = vmul.f32 %v1115_v24, %v2029_v43  ;;  %v978_v35 = vmul.f32 %v960_v32, %v1933_v13 }
 0x478   :  { %v1119_v33 = vmul.f32 0.5, %v1118_v11 }
 0x479   :  { %v1186_v2 = vmul.f32 %v2078_v16, %v1167_v28  ;;  %v994_v39 = vadd.f32 1e-05, %v978_v35 }
 0x47a   :  { %v1120_v54 = vsub.f32 1.5, %v1119_v33 }
 0x47b   :  { %v1407_v41 = vpop.eup %1406  ;;  %v1205_v57 = vadd.f32 %v2085_v60, %v1186_v2  ;;  %1408 = vrsqrt.f32 %v994_v39  ;;  %vm1142_vm1 = vweird.f32 %v994_v39 }
 0x47c   :  { %v1121_v58 = vmul.f32 %v1405_v21, %v1120_v54  ;;  %v1127_v30 = vmul.f32 %v1407_v41, %v993_v56  ;;  %vm1133_vm13 = vweird.f32 %v1407_v41 }
 0x47d   :  { %1221 = vst.msk [vmem:[%s2230_s6 + $0x58] sm:$0xff] %vm812_vm2, %v1205_v57  ;;  %vm1134_vm15 = vmor %vm1132_vm14, %vm1133_vm13 }
 0x47e   :  { %v1125_v43 = vsel %vm1124_vm12, %v1405_v21, %v1121_v58  ;;  %v1128_v42 = vmul.f32 %v1407_v41, %v1127_v30  ;;  %v963_v3 = vpop.xlane.xlu0 %962 }
 0x47f   :  { %v1168_v63 = vmul.f32 %v1125_v43, %v2036_v46  ;;  %v979_v29 = vmul.f32 %v963_v3, %v1933_v13 }
 0x480   :  { %v1129_v34 = vmul.f32 0.5, %v1128_v42 }
 0x481   :  { %v1187_v9 = vmul.f32 %v2078_v16, %v1168_v63  ;;  %v1409_v36 = vpop.eup %1408  ;;  %v995_v44 = vadd.f32 1e-05, %v979_v29 }
 0x482   :  { %v1130_v26 = vsub.f32 1.5, %v1129_v34  ;;  %v1137_v20 = vmul.f32 %v1409_v36, %v994_v39  ;;  %vm1143_vm0 = vweird.f32 %v1409_v36 }
 0x483   :  { %v1206_v40 = vadd.f32 %v2085_v60, %v1187_v9  ;;  %1410 = vrsqrt.f32 %v995_v44  ;;  %vm1144_vm3 = vmor %vm1142_vm1, %vm1143_vm0  ;;  %vm1152_vm5 = vweird.f32 %v995_v44 }
 0x484   :  { %v1131_v38 = vmul.f32 %v1407_v41, %v1130_v26  ;;  %v1138_v46 = vmul.f32 %v1409_v36, %v1137_v20 }
 0x485   :  { %1222 = vst.msk [vmem:[%s2230_s6 + $0x60] sm:$0xff] %vm812_vm2, %v1206_v40 }
 0x486   :  { %v1135_v12 = vsel %vm1134_vm15, %v1407_v41, %v1131_v38  ;;  %v1139_v6 = vmul.f32 0.5, %v1138_v46 }
 0x487   :  { %v1169_v13 = vmul.f32 %v1135_v12, %v2043_v1 }
 0x488   :  { %v1140_v22 = vsub.f32 1.5, %v1139_v6 }
 0x489   :  { %v1188_v49 = vmul.f32 %v2078_v16, %v1169_v13  ;;  %v1411_v59 = vpop.eup %1410 }
 0x48a   :  { %v1141_v51 = vmul.f32 %v1409_v36, %v1140_v22  ;;  %v1147_v19 = vmul.f32 %v1411_v59, %v995_v44  ;;  %vm1153_vm4 = vweird.f32 %v1411_v59 }
 0x48b   :  { %v1207_v23 = vadd.f32 %v2085_v60, %v1188_v49  ;;  %vm1154_vm6 = vmor %vm1152_vm5, %vm1153_vm4 }
 0x48c   :  { %v1145_v53 = vsel %vm1144_vm3, %v1409_v36, %v1141_v51  ;;  %v1148_v10 = vmul.f32 %v1411_v59, %v1147_v19 }
 0x48d   :  { %1223 = vst.msk [vmem:[%s2230_s6 + $0x68] sm:$0xff] %vm812_vm2, %v1207_v23  ;;  %v1170_v1 = vmul.f32 %v1145_v53, %v2051_v50 }
 0x48e   :  { %v1149_v31 = vmul.f32 0.5, %v1148_v10 }
 0x48f   :  { %v1189_v52 = vmul.f32 %v2078_v16, %v1170_v1 }
 0x490   :  { %v1150_v47 = vsub.f32 1.5, %v1149_v31 }
 0x491   :  { %v1208_v15 = vadd.f32 %v2085_v60, %v1189_v52 }
 0x492   :  { %v1151_v7 = vmul.f32 %v1411_v59, %v1150_v47 }
 0x493   :  { %1224 = vst.msk [vmem:[%s2230_s6 + $0x70] sm:$0xff] %vm812_vm2, %v1208_v15 }
 0x494   :  { %v1155_v27 = vsel %vm1154_vm6, %v1411_v59, %v1151_v7 }
 0x495   :  { %v1171_v25 = vmul.f32 %v1155_v27, %v2060_v0 }
 0x497   :  { %v1190_v50 = vmul.f32 %v2078_v16, %v1171_v25 }
 0x499   :  { %v1209_v8 = vadd.f32 %v2085_v60, %v1190_v50 }
 0x49b   :  { %1225 = vst.msk [vmem:[%s2230_s6 + $0x78] sm:$0xff] %vm812_vm2, %v1209_v8 }

</bundles_post_ra>
